<compile_context>
chip_gen: v7x
topology: tpu7x:2x2x1
jax: 0.10.0
libtpu: 0.0.40
codegen_flags: <defaults>
</compile_context>

<pallas_src>
import jax
import jax.numpy as jnp
from jax import lax
from jax.experimental import pallas as pl
from jax.experimental.pallas import tpu as pltpu

EPS = 1e-5


def _round_up(x, m):
    return (x + m - 1) // m * m


def _vmem_bytes(th, Wo, sC0, C1, C2, isz):
    """Rough per-grid-step VMEM working-set estimate (bytes)."""
    Wp = _round_up(Wo + 2, 8)
    x_blk = 2 * (th + 2) * Wo * sC0 * isz          # main + halo blocks (double buffered)
    o_blk = 2 * th * Wo * C2 * isz                 # output block (double buffered)
    wts = 2 * ((sC0 * C1 + 9 * C1 * C1 + C1 * C2) * isz + (2 * sC0 + 4 * C1) * 4)
    mid = (th + 3) * Wp * C1 * isz                 # padded mid-activation scratch
    acc = th * Wp * C1 * 4                         # f32 conv3x3 accumulator
    tmp = ((th + 1) * Wp * C1 + th * Wp * max(C1, C2)) * 4   # large in-kernel temps
    return x_blk + o_blk + wts + mid + acc + 2 * tmp


def _pick_row_tile(Ho, Wo, sC0, C1, C2, isz, budget=16 * 1024 * 1024):
    """Largest divisor of Ho whose per-step working set fits the VMEM budget."""
    th = 1
    for cand in range(1, Ho + 1):
        if Ho % cand == 0 and _vmem_bytes(cand, Wo, sC0, C1, C2, isz) <= budget:
            th = cand
    return th


# ----------------------------------------------------------------------------
# Fused kernel.  One grid step = one batch element x one row tile of the output.
# ----------------------------------------------------------------------------
def _bottleneck_kernel(xm_ref, xt_ref, xb_ref,
                       s1_ref, b1_ref, w1_ref,
                       s2_ref, b2_ref, w2_ref,
                       s3_ref, b3_ref, w3_ref,
                       o_ref, mid_ref, acc_ref):
    th, Wo, sC0 = xm_ref.shape          # main rows of the (stride-folded) input
    C1 = w1_ref.shape[1]
    C2 = w3_ref.shape[1]
    Wp = mid_ref.shape[1]               # padded, 8-aligned row width (>= Wo + 2)
    cdt = mid_ref.dtype                 # compute/MXU dtype (= input dtype)

    r = pl.program_id(1)
    last = pl.num_programs(1) - 1

    # ---- padded mid-activation scratch: zero once, interior overwritten.
    # (Replaces wrapper-side jnp.pad + in-kernel iota masking.)
    mid_ref[...] = jnp.zeros(mid_ref.shape, cdt)

    def bn1_conv1_bn2(x):
        # x: (rows, Wo, s*C0) -> relu(bn2(conv1(relu(bn1(x))))) : (rows, Wo, C1)
        rows = x.shape[0]
        a = jnp.maximum(
            x.reshape(rows * Wo, sC0).astype(jnp.float32) * s1_ref[...]
            + b1_ref[...], 0.0)
        y = jnp.dot(a.astype(cdt), w1_ref[...],
                    preferred_element_type=jnp.float32)
        z = jnp.maximum(y * s2_ref[...] + b2_ref[...], 0.0)
        return z.astype(cdt).reshape(rows, Wo, C1)

    # main rows -> mid rows [1, th+1), columns [1, Wo+1)
    mid_ref[1:th + 1, 1:Wo + 1, :] = bn1_conv1_bn2(xm_ref[...])

    # 1-row halos for the 3x3 conv (recomputed through conv1).  At the image
    # border the padded row must stay zero, so the store is gated with pl.when.
    @pl.when(r > 0)
    def _():
        mid_ref[0:1, 1:Wo + 1, :] = bn1_conv1_bn2(xt_ref[...])

    @pl.when(r < last)
    def _():
        mid_ref[th + 1:th + 2, 1:Wo + 1, :] = bn1_conv1_bn2(xb_ref[...])

    # ---- 3x3 conv: 9 row-offset matmuls over the flattened padded scratch.
    # acc[i*Wp + j] accumulates the conv output at (row i, col j) for j < Wo
    # (the Wp-Wo pad columns are garbage and discarded at the end).
    acc_ref[...] = jnp.zeros(acc_ref.shape, jnp.float32)
    for dh in range(3):
        flat = mid_ref[dh:dh + th + 1, :, :].reshape((th + 1) * Wp, C1)
        for dw in range(3):
            acc_ref[...] += jnp.dot(flat[dw:dw + th * Wp],
                                    w2_ref[dh * 3 + dw],
                                    preferred_element_type=jnp.float32)

    # ---- bn3 -> relu -> conv1x1 -> store the valid columns.
    a3 = jnp.maximum(acc_ref[...] * s3_ref[...] + b3_ref[...], 0.0)
    y3 = jnp.dot(a3.astype(cdt), w3_ref[...],
                 preferred_element_type=jnp.float32)
    o_ref[...] = y3.reshape(th, Wp, C2)[:, :Wo, :].astype(o_ref.dtype)


# ----------------------------------------------------------------------------
# Public wrapper: NCHW in / NCHW out, like the PyTorch module.
# ----------------------------------------------------------------------------
def bottleneck_forward(x_nchw, params, s):
    N, C0, H, W = x_nchw.shape
    w1, w2, w3 = params["w1"], params["w2"], params["w3"]
    C1, C2 = w1.shape[1], w3.shape[1]
    Ho = (H - 1) // s + 1
    Wo = (W - 1) // s + 1

    # Edge transposes are the interface cost of the NCHW convention.
    x = jnp.transpose(x_nchw, (0, 2, 3, 1))                      # -> NHWC
    if H != Ho * s or W != Wo * s:
        # Only taken when H or W is not a multiple of the stride.
        x = jnp.pad(x, ((0, 0), (0, Ho * s - H), (0, Wo * s - W), (0, 0)))

    # Fold the conv1 stride into the layout with a free reshape: dim 2 is the
    # row phase (only phase 0 is ever DMA'd); the column phase lands in the
    # channel dim and is killed by zero rows appended to w1.
    sC0 = s * C0
    x5 = x.reshape(N, Ho, s, Wo, sC0)

    if s > 1:
        w1e = jnp.concatenate(
            [w1, jnp.zeros(((s - 1) * C0, C1), w1.dtype)], axis=0)
        s1e = jnp.tile(params["scale1"], s)
        b1e = jnp.tile(params["bias1"], s)
    else:
        w1e, s1e, b1e = w1, params["scale1"], params["bias1"]

    dt = x.dtype
    th = _pick_row_tile(Ho, Wo, sC0, C1, C2, dt.itemsize)
    n_rt = Ho // th
    Wp = _round_up(Wo + 2, 8)

    row_idx = lambda n, r: (n, r, 0, 0, 0)
    top_idx = lambda n, r: (n, jnp.maximum(r * th - 1, 0), 0, 0, 0)
    bot_idx = lambda n, r: (n, jnp.minimum((r + 1) * th, Ho - 1), 0, 0, 0)
    const2 = lambda n, r: (0, 0)
    const3 = lambda n, r: (0, 0, 0)

    out = pl.pallas_call(
        _bottleneck_kernel,
        out_shape=jax.ShapeDtypeStruct((N, Ho, Wo, C2), dt),
        grid=(N, n_rt),
        in_specs=[
            pl.BlockSpec((None, th, None, Wo, sC0), row_idx),   # main rows
            pl.BlockSpec((None, 1, None, Wo, sC0), top_idx),    # top halo row
            pl.BlockSpec((None, 1, None, Wo, sC0), bot_idx),    # bottom halo row
            pl.BlockSpec((1, sC0), const2),                     # bn1 scale
            pl.BlockSpec((1, sC0), const2),                     # bn1 bias
            pl.BlockSpec((sC0, C1), const2),                    # conv1 weight
            pl.BlockSpec((1, C1), const2),                      # bn2 scale
            pl.BlockSpec((1, C1), const2),                      # bn2 bias
            pl.BlockSpec((9, C1, C1), const3),                  # conv2 weight (taps)
            pl.BlockSpec((1, C1), const2),                      # bn3 scale
            pl.BlockSpec((1, C1), const2),                      # bn3 bias
            pl.BlockSpec((C1, C2), const2),                     # conv3 weight
        ],
        out_specs=pl.BlockSpec((None, th, Wo, C2), lambda n, r: (n, r, 0, 0)),
        scratch_shapes=[
            pltpu.VMEM((th + 3, Wp, C1), dt),         # zero-padded mid activation
            pltpu.VMEM((th * Wp, C1), jnp.float32),   # f32 conv3x3 accumulator
        ],
        compiler_params=pltpu.CompilerParams(
            dimension_semantics=("parallel", "parallel"),
            vmem_limit_bytes=32 * 1024 * 1024),
    )(x5, x5, x5,
      s1e.reshape(1, sC0), b1e.reshape(1, sC0), w1e,
      params["scale2"].reshape(1, C1), params["bias2"].reshape(1, C1),
      w2.reshape(9, C1, C1),
      params["scale3"].reshape(1, C1), params["bias3"].reshape(1, C1),
      w3)
    return jnp.transpose(out, (0, 3, 1, 2))                      # -> NCHW


# Pure-JAX reference used only for a correctness check.
def bottleneck_reference(x_nchw, params, s):
    dn = ("NHWC", "HWIO", "NHWC")
    x = jnp.transpose(x_nchw, (0, 2, 3, 1))
    C0 = params["w1"].shape[0]
    C1 = params["w1"].shape[1]
    C2 = params["w3"].shape[1]
    a = jnp.maximum(x * params["scale1"] + params["bias1"], 0.0)
    y = lax.conv_general_dilated(a, params["w1"].reshape(1, 1, C0, C1),
                                 (s, s), "VALID", dimension_numbers=dn)
    a = jnp.maximum(y * params["scale2"] + params["bias2"], 0.0)
    y = lax.conv_general_dilated(a, params["w2"], (1, 1), "SAME",
                                 dimension_numbers=dn)
    a = jnp.maximum(y * params["scale3"] + params["bias3"], 0.0)
    y = lax.conv_general_dilated(a, params["w3"].reshape(1, 1, C1, C2),
                                 (1, 1), "VALID", dimension_numbers=dn)
    return jnp.transpose(y, (0, 3, 1, 2))


def _fold_bn(gamma, beta, mean, var):
    scale = gamma / jnp.sqrt(var + EPS)
    bias = beta - mean * scale
    return scale, bias


def make_params(key, filters):
    C0, C1, C2 = filters
    ks = jax.random.split(key, 15)

    def bn(i, C):
        gamma = jax.random.uniform(ks[i], (C,), jnp.float32, 0.5, 1.5)
        beta = 0.1 * jax.random.normal(ks[i + 1], (C,), jnp.float32)
        mean = 0.1 * jax.random.normal(ks[i + 2], (C,), jnp.float32)
        var = jax.random.uniform(ks[i + 3], (C,), jnp.float32, 0.5, 1.5)
        return _fold_bn(gamma, beta, mean, var)

    scale1, bias1 = bn(0, C0)
    scale2, bias2 = bn(4, C1)
    scale3, bias3 = bn(8, C1)
    w1 = 0.2 * jax.random.normal(ks[12], (C0, C1), jnp.float32)        # 1x1, IO
    w2 = 0.2 * jax.random.normal(ks[13], (3, 3, C1, C1), jnp.float32)  # HWIO
    w3 = 0.2 * jax.random.normal(ks[14], (C1, C2), jnp.float32)        # 1x1, IO
    return dict(scale1=scale1, bias1=bias1, w1=w1,
                scale2=scale2, bias2=bias2, w2=w2,
                scale3=scale3, bias3=bias3, w3=w3)


if __name__ == "__main__":
    filters = (4, 8, 16)   # filters[0]=in, filters[1]=mid, filters[2]=out
    key = jax.random.PRNGKey(0)
    kx, kp = jax.random.split(key)
    x = jax.random.normal(kx, (2, filters[0], 16, 16), jnp.float32)    # NCHW
    params = make_params(kp, filters)

    fwd = jax.jit(bottleneck_forward, static_argnums=2)
    ref_fn = jax.jit(bottleneck_reference, static_argnums=2)

    for s in (2, 1):       # strided (2) and unit-stride (1) first conv
        out = jax.block_until_ready(fwd(x, params, s))
        ref = jax.block_until_ready(ref_fn(x, params, s))
        assert out.shape == (2, filters[2], 16 // s, 16 // s), out.shape
        err = float(jnp.max(jnp.abs(out - ref)))
        assert jnp.allclose(out, ref, atol=1e-4, rtol=1e-4), err
    print("KERNEL_OK")
</pallas_src>

<mosaic_0001>
module attributes {stable_mosaic.version = 11 : i64} {
  func.func @_bottleneck_kernel(%arg0: i32, %arg1: i32, %arg2: memref<1x8x1x8x8xf32, #tpu.memory_space<vmem>>, %arg3: memref<1x1x1x8x8xf32, #tpu.memory_space<vmem>>, %arg4: memref<1x1x1x8x8xf32, #tpu.memory_space<vmem>>, %arg5: memref<1x8xf32, #tpu.memory_space<vmem>>, %arg6: memref<1x8xf32, #tpu.memory_space<vmem>>, %arg7: memref<8x8xf32, #tpu.memory_space<vmem>>, %arg8: memref<1x8xf32, #tpu.memory_space<vmem>>, %arg9: memref<1x8xf32, #tpu.memory_space<vmem>>, %arg10: memref<9x8x8xf32, #tpu.memory_space<vmem>>, %arg11: memref<1x8xf32, #tpu.memory_space<vmem>>, %arg12: memref<1x8xf32, #tpu.memory_space<vmem>>, %arg13: memref<8x16xf32, #tpu.memory_space<vmem>>, %arg14: memref<1x8x8x16xf32, #tpu.memory_space<vmem>>, %arg15: memref<11x16x8xf32, #tpu.memory_space<vmem>>, %arg16: memref<128x8xf32, #tpu.memory_space<vmem>>) attributes {dimension_semantics = [#tpu.dimension_semantics<parallel>, #tpu.dimension_semantics<parallel>], iteration_bounds = array<i64: 2, 1>, scalar_prefetch = 0 : i64, scratch_operands = 2 : i64, tpu.core_type = #tpu.core_type<tc>, window_params = [{transform_indices = @transform_0, window_bounds = array<i64: 1, 8, 1, 8, 8>}, {transform_indices = @transform_1, window_bounds = array<i64: 1, 1, 1, 8, 8>}, {transform_indices = @transform_2, window_bounds = array<i64: 1, 1, 1, 8, 8>}, {pipeline_mode = #tpu.pipeline_mode<synchronous>, transform_indices = @transform_3, window_bounds = array<i64: 1, 8>}, {pipeline_mode = #tpu.pipeline_mode<synchronous>, transform_indices = @transform_4, window_bounds = array<i64: 1, 8>}, {pipeline_mode = #tpu.pipeline_mode<synchronous>, transform_indices = @transform_5, window_bounds = array<i64: 8, 8>}, {pipeline_mode = #tpu.pipeline_mode<synchronous>, transform_indices = @transform_6, window_bounds = array<i64: 1, 8>}, {pipeline_mode = #tpu.pipeline_mode<synchronous>, transform_indices = @transform_7, window_bounds = array<i64: 1, 8>}, {pipeline_mode = #tpu.pipeline_mode<synchronous>, transform_indices = @transform_8, window_bounds = array<i64: 9, 8, 8>}, {pipeline_mode = #tpu.pipeline_mode<synchronous>, transform_indices = @transform_9, window_bounds = array<i64: 1, 8>}, {pipeline_mode = #tpu.pipeline_mode<synchronous>, transform_indices = @transform_10, window_bounds = array<i64: 1, 8>}, {pipeline_mode = #tpu.pipeline_mode<synchronous>, transform_indices = @transform_11, window_bounds = array<i64: 8, 16>}, {transform_indices = @transform_12, window_bounds = array<i64: 1, 8, 8, 16>}]} {
    %cst = arith.constant 0.000000e+00 : f32
    %0 = vector.broadcast %cst : f32 to vector<11x16x8xf32>
    %c0 = arith.constant 0 : index
    %c0_0 = arith.constant 0 : index
    %c0_1 = arith.constant 0 : index
    %1 = vector.load %arg15[%c0, %c0_0, %c0_1] : memref<11x16x8xf32, #tpu.memory_space<vmem>>, vector<11x16x8xf32>
    tpu.vector_store %arg15[%c0, %c0_0, %c0_1], %0 {strides = array<i32>} : memref<11x16x8xf32, #tpu.memory_space<vmem>>, vector<11x16x8xf32>,
    %c0_2 = arith.constant 0 : index
    %c0_3 = arith.constant 0 : index
    %c0_4 = arith.constant 0 : index
    %c0_5 = arith.constant 0 : index
    %c0_6 = arith.constant 0 : index
    %2 = vector.load %arg2[%c0_2, %c0_3, %c0_4, %c0_5, %c0_6] : memref<1x8x1x8x8xf32, #tpu.memory_space<vmem>>, vector<1x8x1x8x8xf32>
    %3 = vector.shape_cast %2 : vector<1x8x1x8x8xf32> to vector<8x8x8xf32>
    %4 = vector.shape_cast %3 : vector<8x8x8xf32> to vector<64x8xf32>
    %c0_7 = arith.constant 0 : index
    %c0_8 = arith.constant 0 : index
    %5 = vector.load %arg5[%c0_7, %c0_8] : memref<1x8xf32, #tpu.memory_space<vmem>>, vector<1x8xf32>
    %6 = vector.broadcast %5 : vector<1x8xf32> to vector<64x8xf32>
    %7 = arith.mulf %4, %6 : vector<64x8xf32>
    %c0_9 = arith.constant 0 : index
    %c0_10 = arith.constant 0 : index
    %8 = vector.load %arg6[%c0_9, %c0_10] : memref<1x8xf32, #tpu.memory_space<vmem>>, vector<1x8xf32>
    %9 = vector.broadcast %8 : vector<1x8xf32> to vector<64x8xf32>
    %10 = arith.addf %7, %9 : vector<64x8xf32>
    %cst_11 = arith.constant 0.000000e+00 : f32
    %11 = vector.broadcast %cst_11 : f32 to vector<64x8xf32>
    %12 = arith.maximumf %10, %11 : vector<64x8xf32>
    %c0_12 = arith.constant 0 : index
    %c0_13 = arith.constant 0 : index
    %13 = vector.load %arg7[%c0_12, %c0_13] : memref<8x8xf32, #tpu.memory_space<vmem>>, vector<8x8xf32>
    %cst_14 = arith.constant dense<0.000000e+00> : vector<64x8xf32>
    %14 = tpu.matmul %12, %13, %cst_14 {dimension_numbers = #tpu.dot_dimension_numbers<[1], [0], [0], [1], [0, 0, 1, 1], [], []>} : vector<64x8xf32>, vector<8x8xf32>, vector<64x8xf32> -> vector<64x8xf32>
    %c0_15 = arith.constant 0 : index
    %c0_16 = arith.constant 0 : index
    %15 = vector.load %arg8[%c0_15, %c0_16] : memref<1x8xf32, #tpu.memory_space<vmem>>, vector<1x8xf32>
    %16 = vector.broadcast %15 : vector<1x8xf32> to vector<64x8xf32>
    %17 = arith.mulf %14, %16 : vector<64x8xf32>
    %c0_17 = arith.constant 0 : index
    %c0_18 = arith.constant 0 : index
    %18 = vector.load %arg9[%c0_17, %c0_18] : memref<1x8xf32, #tpu.memory_space<vmem>>, vector<1x8xf32>
    %19 = vector.broadcast %18 : vector<1x8xf32> to vector<64x8xf32>
    %20 = arith.addf %17, %19 : vector<64x8xf32>
    %cst_19 = arith.constant 0.000000e+00 : f32
    %21 = vector.broadcast %cst_19 : f32 to vector<64x8xf32>
    %22 = arith.maximumf %20, %21 : vector<64x8xf32>
    %23 = vector.shape_cast %22 : vector<64x8xf32> to vector<8x8x8xf32>
    %c1 = arith.constant 1 : index
    %c1_20 = arith.constant 1 : index
    %c0_21 = arith.constant 0 : index
    %24 = vector.load %arg15[%c1, %c1_20, %c0_21] : memref<11x16x8xf32, #tpu.memory_space<vmem>>, vector<8x8x8xf32>
    tpu.vector_store %arg15[%c1, %c1_20, %c0_21], %23 {strides = array<i32>} : memref<11x16x8xf32, #tpu.memory_space<vmem>>, vector<8x8x8xf32>,
    %c0_i32 = arith.constant 0 : i32
    %25 = arith.cmpi sgt, %arg1, %c0_i32 : i32
    %26 = arith.extui %25 : i1 to i32
    %c0_i32_22 = arith.constant 0 : i32
    %27 = arith.cmpi ne, %26, %c0_i32_22 : i32
    scf.if %27 {
      %c0_116 = arith.constant 0 : index
      %c0_117 = arith.constant 0 : index
      %c0_118 = arith.constant 0 : index
      %c0_119 = arith.constant 0 : index
      %c0_120 = arith.constant 0 : index
      %118 = vector.load %arg3[%c0_116, %c0_117, %c0_118, %c0_119, %c0_120] : memref<1x1x1x8x8xf32, #tpu.memory_space<vmem>>, vector<1x1x1x8x8xf32>
      %119 = vector.shape_cast %118 : vector<1x1x1x8x8xf32> to vector<1x8x8xf32>
      %120 = vector.shape_cast %119 : vector<1x8x8xf32> to vector<8x8xf32>
      %c0_121 = arith.constant 0 : index
      %c0_122 = arith.constant 0 : index
      %121 = vector.load %arg5[%c0_121, %c0_122] : memref<1x8xf32, #tpu.memory_space<vmem>>, vector<1x8xf32>
      %122 = vector.broadcast %121 : vector<1x8xf32> to vector<8x8xf32>
      %123 = arith.mulf %120, %122 : vector<8x8xf32>
      %c0_123 = arith.constant 0 : index
      %c0_124 = arith.constant 0 : index
      %124 = vector.load %arg6[%c0_123, %c0_124] : memref<1x8xf32, #tpu.memory_space<vmem>>, vector<1x8xf32>
      %125 = vector.broadcast %124 : vector<1x8xf32> to vector<8x8xf32>
      %126 = arith.addf %123, %125 : vector<8x8xf32>
      %cst_125 = arith.constant 0.000000e+00 : f32
      %127 = vector.broadcast %cst_125 : f32 to vector<8x8xf32>
      %128 = arith.maximumf %126, %127 : vector<8x8xf32>
      %c0_126 = arith.constant 0 : index
      %c0_127 = arith.constant 0 : index
      %129 = vector.load %arg7[%c0_126, %c0_127] : memref<8x8xf32, #tpu.memory_space<vmem>>, vector<8x8xf32>
      %cst_128 = arith.constant dense<0.000000e+00> : vector<8x8xf32>
      %130 = tpu.matmul %128, %129, %cst_128 {dimension_numbers = #tpu.dot_dimension_numbers<[1], [0], [0], [1], [0, 0, 1, 1], [], []>} : vector<8x8xf32>, vector<8x8xf32>, vector<8x8xf32> -> vector<8x8xf32>
      %c0_129 = arith.constant 0 : index
      %c0_130 = arith.constant 0 : index
      %131 = vector.load %arg8[%c0_129, %c0_130] : memref<1x8xf32, #tpu.memory_space<vmem>>, vector<1x8xf32>
      %132 = vector.broadcast %131 : vector<1x8xf32> to vector<8x8xf32>
      %133 = arith.mulf %130, %132 : vector<8x8xf32>
      %c0_131 = arith.constant 0 : index
      %c0_132 = arith.constant 0 : index
      %134 = vector.load %arg9[%c0_131, %c0_132] : memref<1x8xf32, #tpu.memory_space<vmem>>, vector<1x8xf32>
      %135 = vector.broadcast %134 : vector<1x8xf32> to vector<8x8xf32>
      %136 = arith.addf %133, %135 : vector<8x8xf32>
      %cst_133 = arith.constant 0.000000e+00 : f32
      %137 = vector.broadcast %cst_133 : f32 to vector<8x8xf32>
      %138 = arith.maximumf %136, %137 : vector<8x8xf32>
      %139 = vector.shape_cast %138 : vector<8x8xf32> to vector<1x8x8xf32>
      %c0_134 = arith.constant 0 : index
      %c1_135 = arith.constant 1 : index
      %c0_136 = arith.constant 0 : index
      %140 = vector.load %arg15[%c0_134, %c1_135, %c0_136] : memref<11x16x8xf32, #tpu.memory_space<vmem>>, vector<1x8x8xf32>
      tpu.vector_store %arg15[%c0_134, %c1_135, %c0_136], %139 {strides = array<i32>} : memref<11x16x8xf32, #tpu.memory_space<vmem>>, vector<1x8x8xf32>,
    } else {
    }
    %c0_i32_23 = arith.constant 0 : i32
    %28 = arith.cmpi slt, %arg1, %c0_i32_23 : i32
    %29 = arith.extui %28 : i1 to i32
    %c0_i32_24 = arith.constant 0 : i32
    %30 = arith.cmpi ne, %29, %c0_i32_24 : i32
    scf.if %30 {
      %c0_116 = arith.constant 0 : index
      %c0_117 = arith.constant 0 : index
      %c0_118 = arith.constant 0 : index
      %c0_119 = arith.constant 0 : index
      %c0_120 = arith.constant 0 : index
      %118 = vector.load %arg4[%c0_116, %c0_117, %c0_118, %c0_119, %c0_120] : memref<1x1x1x8x8xf32, #tpu.memory_space<vmem>>, vector<1x1x1x8x8xf32>
      %119 = vector.shape_cast %118 : vector<1x1x1x8x8xf32> to vector<1x8x8xf32>
      %120 = vector.shape_cast %119 : vector<1x8x8xf32> to vector<8x8xf32>
      %c0_121 = arith.constant 0 : index
      %c0_122 = arith.constant 0 : index
      %121 = vector.load %arg5[%c0_121, %c0_122] : memref<1x8xf32, #tpu.memory_space<vmem>>, vector<1x8xf32>
      %122 = vector.broadcast %121 : vector<1x8xf32> to vector<8x8xf32>
      %123 = arith.mulf %120, %122 : vector<8x8xf32>
      %c0_123 = arith.constant 0 : index
      %c0_124 = arith.constant 0 : index
      %124 = vector.load %arg6[%c0_123, %c0_124] : memref<1x8xf32, #tpu.memory_space<vmem>>, vector<1x8xf32>
      %125 = vector.broadcast %124 : vector<1x8xf32> to vector<8x8xf32>
      %126 = arith.addf %123, %125 : vector<8x8xf32>
      %cst_125 = arith.constant 0.000000e+00 : f32
      %127 = vector.broadcast %cst_125 : f32 to vector<8x8xf32>
      %128 = arith.maximumf %126, %127 : vector<8x8xf32>
      %c0_126 = arith.constant 0 : index
      %c0_127 = arith.constant 0 : index
      %129 = vector.load %arg7[%c0_126, %c0_127] : memref<8x8xf32, #tpu.memory_space<vmem>>, vector<8x8xf32>
      %cst_128 = arith.constant dense<0.000000e+00> : vector<8x8xf32>
      %130 = tpu.matmul %128, %129, %cst_128 {dimension_numbers = #tpu.dot_dimension_numbers<[1], [0], [0], [1], [0, 0, 1, 1], [], []>} : vector<8x8xf32>, vector<8x8xf32>, vector<8x8xf32> -> vector<8x8xf32>
      %c0_129 = arith.constant 0 : index
      %c0_130 = arith.constant 0 : index
      %131 = vector.load %arg8[%c0_129, %c0_130] : memref<1x8xf32, #tpu.memory_space<vmem>>, vector<1x8xf32>
      %132 = vector.broadcast %131 : vector<1x8xf32> to vector<8x8xf32>
      %133 = arith.mulf %130, %132 : vector<8x8xf32>
      %c0_131 = arith.constant 0 : index
      %c0_132 = arith.constant 0 : index
      %134 = vector.load %arg9[%c0_131, %c0_132] : memref<1x8xf32, #tpu.memory_space<vmem>>, vector<1x8xf32>
      %135 = vector.broadcast %134 : vector<1x8xf32> to vector<8x8xf32>
      %136 = arith.addf %133, %135 : vector<8x8xf32>
      %cst_133 = arith.constant 0.000000e+00 : f32
      %137 = vector.broadcast %cst_133 : f32 to vector<8x8xf32>
      %138 = arith.maximumf %136, %137 : vector<8x8xf32>
      %139 = vector.shape_cast %138 : vector<8x8xf32> to vector<1x8x8xf32>
      %c9 = arith.constant 9 : index
      %c1_134 = arith.constant 1 : index
      %c0_135 = arith.constant 0 : index
      %140 = vector.load %arg15[%c9, %c1_134, %c0_135] : memref<11x16x8xf32, #tpu.memory_space<vmem>>, vector<1x8x8xf32>
      tpu.vector_store %arg15[%c9, %c1_134, %c0_135], %139 {strides = array<i32>} : memref<11x16x8xf32, #tpu.memory_space<vmem>>, vector<1x8x8xf32>,
    } else {
    }
    %cst_25 = arith.constant 0.000000e+00 : f32
    %31 = vector.broadcast %cst_25 : f32 to vector<128x8xf32>
    %c0_26 = arith.constant 0 : index
    %c0_27 = arith.constant 0 : index
    %32 = vector.load %arg16[%c0_26, %c0_27] : memref<128x8xf32, #tpu.memory_space<vmem>>, vector<128x8xf32>
    tpu.vector_store %arg16[%c0_26, %c0_27], %31 {strides = array<i32>} : memref<128x8xf32, #tpu.memory_space<vmem>>, vector<128x8xf32>,
    %c0_28 = arith.constant 0 : index
    %c0_29 = arith.constant 0 : index
    %c0_30 = arith.constant 0 : index
    %33 = vector.load %arg15[%c0_28, %c0_29, %c0_30] : memref<11x16x8xf32, #tpu.memory_space<vmem>>, vector<9x16x8xf32>
    %34 = vector.shape_cast %33 : vector<9x16x8xf32> to vector<144x8xf32>
    %c0_31 = arith.constant 0 : index
    %c0_32 = arith.constant 0 : index
    %35 = vector.load %arg16[%c0_31, %c0_32] : memref<128x8xf32, #tpu.memory_space<vmem>>, vector<128x8xf32>
    %36 = vector.extract_strided_slice %34 {offsets = [0, 0], sizes = [128, 8], strides = [1, 1]} : vector<144x8xf32> to vector<128x8xf32>
    %c0_33 = arith.constant 0 : index
    %c0_34 = arith.constant 0 : index
    %c0_35 = arith.constant 0 : index
    %37 = vector.load %arg10[%c0_33, %c0_34, %c0_35] : memref<9x8x8xf32, #tpu.memory_space<vmem>>, vector<1x8x8xf32>
    %38 = vector.shape_cast %37 : vector<1x8x8xf32> to vector<8x8xf32>
    %cst_36 = arith.constant dense<0.000000e+00> : vector<128x8xf32>
    %39 = tpu.matmul %36, %38, %cst_36 {dimension_numbers = #tpu.dot_dimension_numbers<[1], [0], [0], [1], [0, 0, 1, 1], [], []>} : vector<128x8xf32>, vector<8x8xf32>, vector<128x8xf32> -> vector<128x8xf32>
    %40 = arith.addf %35, %39 : vector<128x8xf32>
    %c0_37 = arith.constant 0 : index
    %c0_38 = arith.constant 0 : index
    %41 = vector.load %arg16[%c0_37, %c0_38] : memref<128x8xf32, #tpu.memory_space<vmem>>, vector<128x8xf32>
    tpu.vector_store %arg16[%c0_37, %c0_38], %40 {strides = array<i32>} : memref<128x8xf32, #tpu.memory_space<vmem>>, vector<128x8xf32>,
    %c0_39 = arith.constant 0 : index
    %c0_40 = arith.constant 0 : index
    %42 = vector.load %arg16[%c0_39, %c0_40] : memref<128x8xf32, #tpu.memory_space<vmem>>, vector<128x8xf32>
    %43 = vector.extract_strided_slice %34 {offsets = [1, 0], sizes = [128, 8], strides = [1, 1]} : vector<144x8xf32> to vector<128x8xf32>
    %c1_41 = arith.constant 1 : index
    %c0_42 = arith.constant 0 : index
    %c0_43 = arith.constant 0 : index
    %44 = vector.load %arg10[%c1_41, %c0_42, %c0_43] : memref<9x8x8xf32, #tpu.memory_space<vmem>>, vector<1x8x8xf32>
    %45 = vector.shape_cast %44 : vector<1x8x8xf32> to vector<8x8xf32>
    %cst_44 = arith.constant dense<0.000000e+00> : vector<128x8xf32>
    %46 = tpu.matmul %43, %45, %cst_44 {dimension_numbers = #tpu.dot_dimension_numbers<[1], [0], [0], [1], [0, 0, 1, 1], [], []>} : vector<128x8xf32>, vector<8x8xf32>, vector<128x8xf32> -> vector<128x8xf32>
    %47 = arith.addf %42, %46 : vector<128x8xf32>
    %c0_45 = arith.constant 0 : index
    %c0_46 = arith.constant 0 : index
    %48 = vector.load %arg16[%c0_45, %c0_46] : memref<128x8xf32, #tpu.memory_space<vmem>>, vector<128x8xf32>
    tpu.vector_store %arg16[%c0_45, %c0_46], %47 {strides = array<i32>} : memref<128x8xf32, #tpu.memory_space<vmem>>, vector<128x8xf32>,
    %c0_47 = arith.constant 0 : index
    %c0_48 = arith.constant 0 : index
    %49 = vector.load %arg16[%c0_47, %c0_48] : memref<128x8xf32, #tpu.memory_space<vmem>>, vector<128x8xf32>
    %50 = vector.extract_strided_slice %34 {offsets = [2, 0], sizes = [128, 8], strides = [1, 1]} : vector<144x8xf32> to vector<128x8xf32>
    %c2 = arith.constant 2 : index
    %c0_49 = arith.constant 0 : index
    %c0_50 = arith.constant 0 : index
    %51 = vector.load %arg10[%c2, %c0_49, %c0_50] : memref<9x8x8xf32, #tpu.memory_space<vmem>>, vector<1x8x8xf32>
    %52 = vector.shape_cast %51 : vector<1x8x8xf32> to vector<8x8xf32>
    %cst_51 = arith.constant dense<0.000000e+00> : vector<128x8xf32>
    %53 = tpu.matmul %50, %52, %cst_51 {dimension_numbers = #tpu.dot_dimension_numbers<[1], [0], [0], [1], [0, 0, 1, 1], [], []>} : vector<128x8xf32>, vector<8x8xf32>, vector<128x8xf32> -> vector<128x8xf32>
    %54 = arith.addf %49, %53 : vector<128x8xf32>
    %c0_52 = arith.constant 0 : index
    %c0_53 = arith.constant 0 : index
    %55 = vector.load %arg16[%c0_52, %c0_53] : memref<128x8xf32, #tpu.memory_space<vmem>>, vector<128x8xf32>
    tpu.vector_store %arg16[%c0_52, %c0_53], %54 {strides = array<i32>} : memref<128x8xf32, #tpu.memory_space<vmem>>, vector<128x8xf32>,
    %c1_54 = arith.constant 1 : index
    %c0_55 = arith.constant 0 : index
    %c0_56 = arith.constant 0 : index
    %56 = vector.load %arg15[%c1_54, %c0_55, %c0_56] : memref<11x16x8xf32, #tpu.memory_space<vmem>>, vector<9x16x8xf32>
    %57 = vector.shape_cast %56 : vector<9x16x8xf32> to vector<144x8xf32>
    %c0_57 = arith.constant 0 : index
    %c0_58 = arith.constant 0 : index
    %58 = vector.load %arg16[%c0_57, %c0_58] : memref<128x8xf32, #tpu.memory_space<vmem>>, vector<128x8xf32>
    %59 = vector.extract_strided_slice %57 {offsets = [0, 0], sizes = [128, 8], strides = [1, 1]} : vector<144x8xf32> to vector<128x8xf32>
    %c3 = arith.constant 3 : index
    %c0_59 = arith.constant 0 : index
    %c0_60 = arith.constant 0 : index
    %60 = vector.load %arg10[%c3, %c0_59, %c0_60] : memref<9x8x8xf32, #tpu.memory_space<vmem>>, vector<1x8x8xf32>
    %61 = vector.shape_cast %60 : vector<1x8x8xf32> to vector<8x8xf32>
    %cst_61 = arith.constant dense<0.000000e+00> : vector<128x8xf32>
    %62 = tpu.matmul %59, %61, %cst_61 {dimension_numbers = #tpu.dot_dimension_numbers<[1], [0], [0], [1], [0, 0, 1, 1], [], []>} : vector<128x8xf32>, vector<8x8xf32>, vector<128x8xf32> -> vector<128x8xf32>
    %63 = arith.addf %58, %62 : vector<128x8xf32>
    %c0_62 = arith.constant 0 : index
    %c0_63 = arith.constant 0 : index
    %64 = vector.load %arg16[%c0_62, %c0_63] : memref<128x8xf32, #tpu.memory_space<vmem>>, vector<128x8xf32>
    tpu.vector_store %arg16[%c0_62, %c0_63], %63 {strides = array<i32>} : memref<128x8xf32, #tpu.memory_space<vmem>>, vector<128x8xf32>,
    %c0_64 = arith.constant 0 : index
    %c0_65 = arith.constant 0 : index
    %65 = vector.load %arg16[%c0_64, %c0_65] : memref<128x8xf32, #tpu.memory_space<vmem>>, vector<128x8xf32>
    %66 = vector.extract_strided_slice %57 {offsets = [1, 0], sizes = [128, 8], strides = [1, 1]} : vector<144x8xf32> to vector<128x8xf32>
    %c4 = arith.constant 4 : index
    %c0_66 = arith.constant 0 : index
    %c0_67 = arith.constant 0 : index
    %67 = vector.load %arg10[%c4, %c0_66, %c0_67] : memref<9x8x8xf32, #tpu.memory_space<vmem>>, vector<1x8x8xf32>
    %68 = vector.shape_cast %67 : vector<1x8x8xf32> to vector<8x8xf32>
    %cst_68 = arith.constant dense<0.000000e+00> : vector<128x8xf32>
    %69 = tpu.matmul %66, %68, %cst_68 {dimension_numbers = #tpu.dot_dimension_numbers<[1], [0], [0], [1], [0, 0, 1, 1], [], []>} : vector<128x8xf32>, vector<8x8xf32>, vector<128x8xf32> -> vector<128x8xf32>
    %70 = arith.addf %65, %69 : vector<128x8xf32>
    %c0_69 = arith.constant 0 : index
    %c0_70 = arith.constant 0 : index
    %71 = vector.load %arg16[%c0_69, %c0_70] : memref<128x8xf32, #tpu.memory_space<vmem>>, vector<128x8xf32>
    tpu.vector_store %arg16[%c0_69, %c0_70], %70 {strides = array<i32>} : memref<128x8xf32, #tpu.memory_space<vmem>>, vector<128x8xf32>,
    %c0_71 = arith.constant 0 : index
    %c0_72 = arith.constant 0 : index
    %72 = vector.load %arg16[%c0_71, %c0_72] : memref<128x8xf32, #tpu.memory_space<vmem>>, vector<128x8xf32>
    %73 = vector.extract_strided_slice %57 {offsets = [2, 0], sizes = [128, 8], strides = [1, 1]} : vector<144x8xf32> to vector<128x8xf32>
    %c5 = arith.constant 5 : index
    %c0_73 = arith.constant 0 : index
    %c0_74 = arith.constant 0 : index
    %74 = vector.load %arg10[%c5, %c0_73, %c0_74] : memref<9x8x8xf32, #tpu.memory_space<vmem>>, vector<1x8x8xf32>
    %75 = vector.shape_cast %74 : vector<1x8x8xf32> to vector<8x8xf32>
    %cst_75 = arith.constant dense<0.000000e+00> : vector<128x8xf32>
    %76 = tpu.matmul %73, %75, %cst_75 {dimension_numbers = #tpu.dot_dimension_numbers<[1], [0], [0], [1], [0, 0, 1, 1], [], []>} : vector<128x8xf32>, vector<8x8xf32>, vector<128x8xf32> -> vector<128x8xf32>
    %77 = arith.addf %72, %76 : vector<128x8xf32>
    %c0_76 = arith.constant 0 : index
    %c0_77 = arith.constant 0 : index
    %78 = vector.load %arg16[%c0_76, %c0_77] : memref<128x8xf32, #tpu.memory_space<vmem>>, vector<128x8xf32>
    tpu.vector_store %arg16[%c0_76, %c0_77], %77 {strides = array<i32>} : memref<128x8xf32, #tpu.memory_space<vmem>>, vector<128x8xf32>,
    %c2_78 = arith.constant 2 : index
    %c0_79 = arith.constant 0 : index
    %c0_80 = arith.constant 0 : index
    %79 = vector.load %arg15[%c2_78, %c0_79, %c0_80] : memref<11x16x8xf32, #tpu.memory_space<vmem>>, vector<9x16x8xf32>
    %80 = vector.shape_cast %79 : vector<9x16x8xf32> to vector<144x8xf32>
    %c0_81 = arith.constant 0 : index
    %c0_82 = arith.constant 0 : index
    %81 = vector.load %arg16[%c0_81, %c0_82] : memref<128x8xf32, #tpu.memory_space<vmem>>, vector<128x8xf32>
    %82 = vector.extract_strided_slice %80 {offsets = [0, 0], sizes = [128, 8], strides = [1, 1]} : vector<144x8xf32> to vector<128x8xf32>
    %c6 = arith.constant 6 : index
    %c0_83 = arith.constant 0 : index
    %c0_84 = arith.constant 0 : index
    %83 = vector.load %arg10[%c6, %c0_83, %c0_84] : memref<9x8x8xf32, #tpu.memory_space<vmem>>, vector<1x8x8xf32>
    %84 = vector.shape_cast %83 : vector<1x8x8xf32> to vector<8x8xf32>
    %cst_85 = arith.constant dense<0.000000e+00> : vector<128x8xf32>
    %85 = tpu.matmul %82, %84, %cst_85 {dimension_numbers = #tpu.dot_dimension_numbers<[1], [0], [0], [1], [0, 0, 1, 1], [], []>} : vector<128x8xf32>, vector<8x8xf32>, vector<128x8xf32> -> vector<128x8xf32>
    %86 = arith.addf %81, %85 : vector<128x8xf32>
    %c0_86 = arith.constant 0 : index
    %c0_87 = arith.constant 0 : index
    %87 = vector.load %arg16[%c0_86, %c0_87] : memref<128x8xf32, #tpu.memory_space<vmem>>, vector<128x8xf32>
    tpu.vector_store %arg16[%c0_86, %c0_87], %86 {strides = array<i32>} : memref<128x8xf32, #tpu.memory_space<vmem>>, vector<128x8xf32>,
    %c0_88 = arith.constant 0 : index
    %c0_89 = arith.constant 0 : index
    %88 = vector.load %arg16[%c0_88, %c0_89] : memref<128x8xf32, #tpu.memory_space<vmem>>, vector<128x8xf32>
    %89 = vector.extract_strided_slice %80 {offsets = [1, 0], sizes = [128, 8], strides = [1, 1]} : vector<144x8xf32> to vector<128x8xf32>
    %c7 = arith.constant 7 : index
    %c0_90 = arith.constant 0 : index
    %c0_91 = arith.constant 0 : index
    %90 = vector.load %arg10[%c7, %c0_90, %c0_91] : memref<9x8x8xf32, #tpu.memory_space<vmem>>, vector<1x8x8xf32>
    %91 = vector.shape_cast %90 : vector<1x8x8xf32> to vector<8x8xf32>
    %cst_92 = arith.constant dense<0.000000e+00> : vector<128x8xf32>
    %92 = tpu.matmul %89, %91, %cst_92 {dimension_numbers = #tpu.dot_dimension_numbers<[1], [0], [0], [1], [0, 0, 1, 1], [], []>} : vector<128x8xf32>, vector<8x8xf32>, vector<128x8xf32> -> vector<128x8xf32>
    %93 = arith.addf %88, %92 : vector<128x8xf32>
    %c0_93 = arith.constant 0 : index
    %c0_94 = arith.constant 0 : index
    %94 = vector.load %arg16[%c0_93, %c0_94] : memref<128x8xf32, #tpu.memory_space<vmem>>, vector<128x8xf32>
    tpu.vector_store %arg16[%c0_93, %c0_94], %93 {strides = array<i32>} : memref<128x8xf32, #tpu.memory_space<vmem>>, vector<128x8xf32>,
    %c0_95 = arith.constant 0 : index
    %c0_96 = arith.constant 0 : index
    %95 = vector.load %arg16[%c0_95, %c0_96] : memref<128x8xf32, #tpu.memory_space<vmem>>, vector<128x8xf32>
    %96 = vector.extract_strided_slice %80 {offsets = [2, 0], sizes = [128, 8], strides = [1, 1]} : vector<144x8xf32> to vector<128x8xf32>
    %c8 = arith.constant 8 : index
    %c0_97 = arith.constant 0 : index
    %c0_98 = arith.constant 0 : index
    %97 = vector.load %arg10[%c8, %c0_97, %c0_98] : memref<9x8x8xf32, #tpu.memory_space<vmem>>, vector<1x8x8xf32>
    %98 = vector.shape_cast %97 : vector<1x8x8xf32> to vector<8x8xf32>
    %cst_99 = arith.constant dense<0.000000e+00> : vector<128x8xf32>
    %99 = tpu.matmul %96, %98, %cst_99 {dimension_numbers = #tpu.dot_dimension_numbers<[1], [0], [0], [1], [0, 0, 1, 1], [], []>} : vector<128x8xf32>, vector<8x8xf32>, vector<128x8xf32> -> vector<128x8xf32>
    %100 = arith.addf %95, %99 : vector<128x8xf32>
    %c0_100 = arith.constant 0 : index
    %c0_101 = arith.constant 0 : index
    %101 = vector.load %arg16[%c0_100, %c0_101] : memref<128x8xf32, #tpu.memory_space<vmem>>, vector<128x8xf32>
    tpu.vector_store %arg16[%c0_100, %c0_101], %100 {strides = array<i32>} : memref<128x8xf32, #tpu.memory_space<vmem>>, vector<128x8xf32>,
    %c0_102 = arith.constant 0 : index
    %c0_103 = arith.constant 0 : index
    %102 = vector.load %arg16[%c0_102, %c0_103] : memref<128x8xf32, #tpu.memory_space<vmem>>, vector<128x8xf32>
    %c0_104 = arith.constant 0 : index
    %c0_105 = arith.constant 0 : index
    %103 = vector.load %arg11[%c0_104, %c0_105] : memref<1x8xf32, #tpu.memory_space<vmem>>, vector<1x8xf32>
    %104 = vector.broadcast %103 : vector<1x8xf32> to vector<128x8xf32>
    %105 = arith.mulf %102, %104 : vector<128x8xf32>
    %c0_106 = arith.constant 0 : index
    %c0_107 = arith.constant 0 : index
    %106 = vector.load %arg12[%c0_106, %c0_107] : memref<1x8xf32, #tpu.memory_space<vmem>>, vector<1x8xf32>
    %107 = vector.broadcast %106 : vector<1x8xf32> to vector<128x8xf32>
    %108 = arith.addf %105, %107 : vector<128x8xf32>
    %cst_108 = arith.constant 0.000000e+00 : f32
    %109 = vector.broadcast %cst_108 : f32 to vector<128x8xf32>
    %110 = arith.maximumf %108, %109 : vector<128x8xf32>
    %c0_109 = arith.constant 0 : index
    %c0_110 = arith.constant 0 : index
    %111 = vector.load %arg13[%c0_109, %c0_110] : memref<8x16xf32, #tpu.memory_space<vmem>>, vector<8x16xf32>
    %cst_111 = arith.constant dense<0.000000e+00> : vector<128x16xf32>
    %112 = tpu.matmul %110, %111, %cst_111 {dimension_numbers = #tpu.dot_dimension_numbers<[1], [0], [0], [1], [0, 0, 1, 1], [], []>} : vector<128x8xf32>, vector<8x16xf32>, vector<128x16xf32> -> vector<128x16xf32>
    %113 = vector.shape_cast %112 : vector<128x16xf32> to vector<8x16x16xf32>
    %114 = vector.extract_strided_slice %113 {offsets = [0, 0, 0], sizes = [8, 8, 16], strides = [1, 1, 1]} : vector<8x16x16xf32> to vector<8x8x16xf32>
    %c0_112 = arith.constant 0 : index
    %c0_113 = arith.constant 0 : index
    %c0_114 = arith.constant 0 : index
    %c0_115 = arith.constant 0 : index
    %115 = vector.load %arg14[%c0_112, %c0_113, %c0_114, %c0_115] : memref<1x8x8x16xf32, #tpu.memory_space<vmem>>, vector<1x8x8x16xf32>
    %116 = vector.shape_cast %115 : vector<1x8x8x16xf32> to vector<8x8x16xf32>
    %117 = vector.shape_cast %114 : vector<8x8x16xf32> to vector<1x8x8x16xf32>
    tpu.vector_store %arg14[%c0_112, %c0_113, %c0_114, %c0_115], %117 {strides = array<i32>} : memref<1x8x8x16xf32, #tpu.memory_space<vmem>>, vector<1x8x8x16xf32>,
    return
  }
  func.func @transform_0(%arg0: i32, %arg1: i32) -> (i32, i32, i32, i32, i32) {
    %c0_i32 = arith.constant 0 : i32
    %c0_i32_0 = arith.constant 0 : i32
    %c0_i32_1 = arith.constant 0 : i32
    %c0_i32_2 = arith.constant 0 : i32
    return %arg0, %arg1, %c0_i32, %c0_i32_0, %c0_i32_1 : i32, i32, i32, i32, i32
  }
  func.func @transform_1(%arg0: i32, %arg1: i32) -> (i32, i32, i32, i32, i32) {
    %c8_i32 = arith.constant 8 : i32
    %0 = arith.muli %arg1, %c8_i32 : i32
    %c1_i32 = arith.constant 1 : i32
    %1 = arith.subi %0, %c1_i32 : i32
    %c0_i32 = arith.constant 0 : i32
    %2 = arith.maxsi %1, %c0_i32 : i32
    %c0_i32_0 = arith.constant 0 : i32
    %c0_i32_1 = arith.constant 0 : i32
    %c0_i32_2 = arith.constant 0 : i32
    %c0_i32_3 = arith.constant 0 : i32
    return %arg0, %2, %c0_i32_0, %c0_i32_1, %c0_i32_2 : i32, i32, i32, i32, i32
  }
  func.func @transform_2(%arg0: i32, %arg1: i32) -> (i32, i32, i32, i32, i32) {
    %c1_i32 = arith.constant 1 : i32
    %0 = arith.addi %arg1, %c1_i32 : i32
    %c8_i32 = arith.constant 8 : i32
    %1 = arith.muli %0, %c8_i32 : i32
    %c7_i32 = arith.constant 7 : i32
    %2 = arith.minsi %1, %c7_i32 : i32
    %c0_i32 = arith.constant 0 : i32
    %c0_i32_0 = arith.constant 0 : i32
    %c0_i32_1 = arith.constant 0 : i32
    %c0_i32_2 = arith.constant 0 : i32
    return %arg0, %2, %c0_i32, %c0_i32_0, %c0_i32_1 : i32, i32, i32, i32, i32
  }
  func.func @transform_3(%arg0: i32, %arg1: i32) -> (i32, i32) {
    %c0_i32 = arith.constant 0 : i32
    %c0_i32_0 = arith.constant 0 : i32
    %c0_i32_1 = arith.constant 0 : i32
    return %c0_i32, %c0_i32_0 : i32, i32
  }
  func.func @transform_4(%arg0: i32, %arg1: i32) -> (i32, i32) {
    %c0_i32 = arith.constant 0 : i32
    %c0_i32_0 = arith.constant 0 : i32
    %c0_i32_1 = arith.constant 0 : i32
    return %c0_i32, %c0_i32_0 : i32, i32
  }
  func.func @transform_5(%arg0: i32, %arg1: i32) -> (i32, i32) {
    %c0_i32 = arith.constant 0 : i32
    %c0_i32_0 = arith.constant 0 : i32
    %c0_i32_1 = arith.constant 0 : i32
    return %c0_i32, %c0_i32_0 : i32, i32
  }
  func.func @transform_6(%arg0: i32, %arg1: i32) -> (i32, i32) {
    %c0_i32 = arith.constant 0 : i32
    %c0_i32_0 = arith.constant 0 : i32
    %c0_i32_1 = arith.constant 0 : i32
    return %c0_i32, %c0_i32_0 : i32, i32
  }
  func.func @transform_7(%arg0: i32, %arg1: i32) -> (i32, i32) {
    %c0_i32 = arith.constant 0 : i32
    %c0_i32_0 = arith.constant 0 : i32
    %c0_i32_1 = arith.constant 0 : i32
    return %c0_i32, %c0_i32_0 : i32, i32
  }
  func.func @transform_8(%arg0: i32, %arg1: i32) -> (i32, i32, i32) {
    %c0_i32 = arith.constant 0 : i32
    %c0_i32_0 = arith.constant 0 : i32
    %c0_i32_1 = arith.constant 0 : i32
    %c0_i32_2 = arith.constant 0 : i32
    return %c0_i32, %c0_i32_0, %c0_i32_1 : i32, i32, i32
  }
  func.func @transform_9(%arg0: i32, %arg1: i32) -> (i32, i32) {
    %c0_i32 = arith.constant 0 : i32
    %c0_i32_0 = arith.constant 0 : i32
    %c0_i32_1 = arith.constant 0 : i32
    return %c0_i32, %c0_i32_0 : i32, i32
  }
  func.func @transform_10(%arg0: i32, %arg1: i32) -> (i32, i32) {
    %c0_i32 = arith.constant 0 : i32
    %c0_i32_0 = arith.constant 0 : i32
    %c0_i32_1 = arith.constant 0 : i32
    return %c0_i32, %c0_i32_0 : i32, i32
  }
  func.func @transform_11(%arg0: i32, %arg1: i32) -> (i32, i32) {
    %c0_i32 = arith.constant 0 : i32
    %c0_i32_0 = arith.constant 0 : i32
    %c0_i32_1 = arith.constant 0 : i32
    return %c0_i32, %c0_i32_0 : i32, i32
  }
  func.func @transform_12(%arg0: i32, %arg1: i32) -> (i32, i32, i32, i32) {
    %c0_i32 = arith.constant 0 : i32
    %c0_i32_0 = arith.constant 0 : i32
    %c0_i32_1 = arith.constant 0 : i32
    return %arg0, %arg1, %c0_i32, %c0_i32_0 : i32, i32, i32, i32
  }
}

</mosaic_0001>

<bundles_post_ra>
// kernel: tile.13
= control target key start
LH: loop header
LB: loop body
LE: loop exit
PB: predicated region body
PF: predicated region fallthrough
CT: control target
= control target key end

     0   :  { %s22_s0 = inlined_call_operand.vmem [shape: f32[4], index: 0, kind: input, shape index: {}]   ;;  %s23_s1 = inlined_call_operand.vmem [shape: f32[2,4], index: 1, kind: output, shape index: {}]  }
   0x1   :  { %v4_v0 = vld [vmem:[%s22_s0] ss:$0 sm:$0xff] }
   0x2   :  { %5 = vst [vmem:[%s23_s1] sm:$0x3] %v4_v0 }

// kernel: tile.18
= control target key start
LH: loop header
LB: loop body
LE: loop exit
PB: predicated region body
PF: predicated region fallthrough
CT: control target
= control target key end

     0   :  { %vm7_vm0 = vcmask 31744   ;;  %vm13_vm1 = vcmask 64544   ;;  %s39_s0 = inlined_call_operand.vmem [shape: f32[2,4], index: 0, kind: input, shape index: {}]   ;;  %s40_s1 = inlined_call_operand.vmem [shape: f32[1,8], index: 1, kind: output, shape index: {}]  }
   0x1   :  { %v4_v0 = vld [vmem:[%s39_s0] sm:$0x3]  ;;  %s22_s0 = smov 4  }
   0x2   :  { %5 = vst [vmem:[#allocation1] sm:$0x3] %v4_v0 }
   0x9   :  { %v10_v1 = vld [vmem:[#allocation1 + $0x1] sm:$0x1]   ;;  %v6_v2 = vld [vmem:[#allocation1] sm:$0x1]  }
   0xa   :  { %11 = vrot.lane.b32.xlu0 %v10_v1, %s22_s0  ;;  %8 = vst.msk [vmem:[#allocation0] sm:$0x1] %vm7_vm0, %v6_v2  }
  0x7c   :  { %v12_v3 = vpop.permute.xlu0 %11  }
  0x7d   :  { %14 = vst.msk [vmem:[#allocation0] sm:$0x1] %vm13_vm1, %v12_v3  }
  0x84   :  { %v18_v4 = vld [vmem:[#allocation0] sm:$0x1] }
  0x85   :  { %20 = vst [vmem:[%s40_s1] sm:$0x1] %v18_v4 }

// kernel: bottleneck_forward.1
= control target key start
LH: loop header
LB: loop body
LE: loop exit
PB: predicated region body
PF: predicated region fallthrough
CT: control target
= control target key end

     0   :  { %17 = vsyncpa [#allocation6], 0  ;;  %s5666_s0 = inlined_call_operand.vmem [shape: f32[2,8,2,8,8], index: 0, kind: input, shape index: {}, may-alias: {0,1,2}]   ;;  %s5667_s1 = inlined_call_operand.vmem [shape: f32[2,8,2,8,8], index: 1, kind: input, shape index: {}, may-alias: {0,1,2}]   ;;  %s5668_s2 = inlined_call_operand.vmem [shape: f32[2,8,2,8,8], index: 2, kind: input, shape index: {}, may-alias: {0,1,2}]   ;;  %s5669_s3 = inlined_call_operand.vmem [shape: f32[1,8], index: 3, kind: input, shape index: {}]   ;;  %s5670_s4 = inlined_call_operand.vmem [shape: f32[1,8], index: 4, kind: input, shape index: {}]   ;;  %s5671_s5 = inlined_call_operand.vmem [shape: f32[8,8], index: 5, kind: input, shape index: {}]   ;;  %s5672_s6 = inlined_call_operand.vmem [shape: f32[1,8], index: 6, kind: input, shape index: {}]   ;;  %s5673_s7 = inlined_call_operand.vmem [shape: f32[1,8], index: 7, kind: input, shape index: {}]   ;;  %s5674_s8 = inlined_call_operand.vmem [shape: f32[9,8,8], index: 8, kind: input, shape index: {}]   ;;  %s5675_s9 = inlined_call_operand.vmem [shape: f32[1,8], index: 9, kind: input, shape index: {}]   ;;  %s5676_s10 = inlined_call_operand.vmem [shape: f32[1,8], index: 10, kind: input, shape index: {}]   ;;  %s5677_s11 = inlined_call_operand.vmem [shape: f32[8,16], index: 11, kind: input, shape index: {}]   ;;  %s5678_s12 = inlined_call_operand.hbm [shape: f32[2,8,8,16], index: 12, kind: output, shape index: {}]  }
   0x1   :  { %19 = vsyncpa [#allocation6 + $0x1], 0  ;;  %s4747_s19 = smov 0   ;;  %s4749_s20 = smov 0  }
   0x2   :  { %s4751_s21 = smov 0   ;;  %s4753_s22 = smov 0  }
   0x3   :  { %s4755_s23 = smov 0   ;;  %s4757_s24 = smov 0  }
   0x4 LB: > { %s3869_s25 = sadd.s32 4294967295, %s4676_s24   ;;  %s3870_s26 = sadd.s32 4294967294, %s4676_s24   ;;  %s4676_s24 = sphi %s4757_s24, %s25_s24   ;;  %s4672_s23 = sphi %s4755_s23, %s5685_s23   ;;  %s4668_s22 = sphi %s4753_s22, %s5684_s22   ;;  %s4664_s21 = sphi %s4751_s21, %s5683_s21   ;;  %s4660_s20 = sphi %s4749_s20, %s5682_s20   ;;  %s4656_s19 = sphi %s4747_s19, %s5681_s19  }
   0x5   : > { %s37_s27 = sadd.s32 1, %s4672_s23  ;;  %s46_s28 = sadd.s32 1, %s4664_s21 }
   0x6   : > { %p39_p0 = scmp.ge.s32.totalorder %s37_s27, 2  ;;  %p53_p1 = scmp.ne.s32.totalorder %s4664_s21, %s4660_s20 }
   0x7   : > { %p54_p2 = scmp.eq.s32.totalorder %s4676_s24, 0  ;;  %p346_p3 = scmp.eq.s32.totalorder %s3869_s25, 1 }
   0x8   : > { %s5687_s27 = smov (%p39_p0, %s37_s27), 0  ;;  %p351_p6 = scmp.ne.s32.totalorder %s4660_s20, %s4656_s19 }
   0x9   : > { %p55_p4 = por %p54_p2, %p53_p1  ;;  %p4786_p5 = por %p346_p3, %p53_p1 }
   0xa   : > { %s41_s1 = ssub.s32 %s4672_s23, %s5687_s27  ;;  %p352_p8 = scmp.eq.s32.totalorder %s3870_s26, 1 }
   0xb   : > { %p44_p7 = scmp.eq.s32.totalorder %s41_s1, 0  ;;  %p3872_p10 = scmp.ge.s32.totalorder %s4676_s24, 2 }
   0xc   : > { %p4797_p9 = por %p352_p8, %p351_p6 }
   0xd   : > { %s4795_s30 = scalar_select %p44_p7, %s4664_s21, %s46_s28  }
   0xe   : > { %395 = sbr.rel (%p3872_p10) target bundleno = 29 (0x1d), region = 52 }
  0x15   : > { %398 = sbr.rel (!%p55_p4) target bundleno = 29 (0x1d), region = 56  ;;  %s400_s13 = sand.u32 (%p55_p4), 1, %s4664_s21  }
  0x16   : > { %s4080_s14 = sshll.u32 (%p55_p4), %s4672_s23, 7  ;;  %s3873_s15 = sshll.u32 (%p55_p4), %s400_s13, 6 }
  0x17   : > { %s408_s18 = scalar_lea.vmem (%p55_p4), %s5666_s0, %s4080_s14  ;;  %s402_s25 = scalar_lea.vmem (%p55_p4), [#allocation4], %s3873_s15 }
  0x18   : > { %v450_v0 = vld [vmem:[%s408_s18] sm:$0xff] (%p55_p4)  ;;  %v452_v1 = vld [vmem:[%s408_s18 + $0x10] sm:$0xff] (%p55_p4) }
  0x19   : > { %v454_v2 = vld [vmem:[%s408_s18 + $0x20] sm:$0xff] (%p55_p4)  ;;  %451 = vst [vmem:[%s402_s25] sm:$0xff] (%p55_p4), %v450_v0  ;;  %453 = vst [vmem:[%s402_s25 + $0x8] sm:$0xff] (%p55_p4), %v452_v1  ;;  %v456_v3 = vld [vmem:[%s408_s18 + $0x30] sm:$0xff] (%p55_p4) }
  0x1a   : > { %455 = vst [vmem:[%s402_s25 + $0x10] sm:$0xff] (%p55_p4), %v454_v2  ;;  %v458_v4 = vld [vmem:[%s408_s18 + $0x40] sm:$0xff] (%p55_p4)  ;;  %v460_v5 = vld [vmem:[%s408_s18 + $0x50] sm:$0xff] (%p55_p4)  ;;  %457 = vst [vmem:[%s402_s25 + $0x18] sm:$0xff] (%p55_p4), %v456_v3 }
  0x1b   : > { %459 = vst [vmem:[%s402_s25 + $0x20] sm:$0xff] (%p55_p4), %v458_v4  ;;  %461 = vst [vmem:[%s402_s25 + $0x28] sm:$0xff] (%p55_p4), %v460_v5  ;;  %v462_v6 = vld [vmem:[%s408_s18 + $0x60] sm:$0xff] (%p55_p4)  ;;  %v464_v7 = vld [vmem:[%s408_s18 + $0x70] sm:$0xff] (%p55_p4) }
  0x1c   : > { %463 = vst [vmem:[%s402_s25 + $0x30] sm:$0xff] %v462_v6  ;;  %465 = vst [vmem:[%s402_s25 + $0x38] sm:$0xff] %v464_v7 }
  0x1d PF: > { %p3876_p11 = scmp.ge.s32.totalorder %s4676_s24, 1  ;;  %p510_p12 = scmp.lt.s32.totalorder %s4676_s24, 3 }
  0x1f   : > { %p511_p13 = pnand %p3876_p11, %p510_p12 }
  0x20   : > { %v689_v8 = vld [vmem:[%s5671_s5] sm:$0xff] (!%p511_p13)  ;;  %s517_s1 = sand.u32 (!%p511_p13), 1, %s4660_s20   ;;  %vm620_vm0 = vcmask (!%p511_p13), 64512   ;;  %v4678_v10 = vmov (!%p511_p13), 0.0   ;;  %v3938_v47 = vld [vmem:[%s5674_s8 + $0x10] sm:$0xff] (!%p511_p13)  ;;  %v3921_v50 = vld [vmem:[%s5674_s8 + $0x8] sm:$0xff] (!%p511_p13) }
  0x21   : > { %514 = sbr.rel (%p511_p13) target bundleno = 881 (0x371), region = 102  ;;  %4264 = vmatprep.subr.mxu0 (!%p511_p13), %v689_v8  ;;  %s4817_s13 = sshll.u32 (!%p511_p13), %s517_s1, 6  ;;  %v4822_v9 = vld [vmem:[%s5669_s3] ss:$0 sm:$0xff] (!%p511_p13)  ;;  %4538 = vmatprep.subr.mxu1 (!%p511_p13), %v689_v8  ;;  %625 = vst.msk [vmem:[#allocation2 + $0x20] sm:$0xff] (!%p511_p13), %vm620_vm0, %v4678_v10  ;;  %626 = vst.msk [vmem:[#allocation2 + $0x28] sm:$0xff] (!%p511_p13), %vm620_vm0, %v4678_v10 }
  0x22   : > { %621 = vst.msk [vmem:[#allocation2] sm:$0xff] (!%p511_p13), %vm620_vm0, %v4678_v10  ;;  %622 = vst.msk [vmem:[#allocation2 + $0x8] sm:$0xff] (!%p511_p13), %vm620_vm0, %v4678_v10  ;;  %4265 = vmatpush3.msra.mxu0 (!%p511_p13), %v689_v8  ;;  %v3884_v11 = vld [vmem:[%s5670_s4] ss:$0 sm:$0xff] (!%p511_p13)  ;;  %4539 = vmatpush3.msra.mxu1 (!%p511_p13), %v689_v8  ;;  %s519_s18 = scalar_lea.vmem (!%p511_p13), [#allocation4], %s4817_s13  ;;  %vm1389_vm1 = vcmask (!%p511_p13), 1046528  }
  0x23   : > { %623 = vst.msk [vmem:[#allocation2 + $0x10] sm:$0xff] (!%p511_p13), %vm620_vm0, %v4678_v10  ;;  %624 = vst.msk [vmem:[#allocation2 + $0x18] sm:$0xff] (!%p511_p13), %vm620_vm0, %v4678_v10  ;;  %v643_v12 = vld [vmem:[%s519_s18] sm:$0xff] (!%p511_p13)  ;;  %v644_v13 = vld [vmem:[%s519_s18 + $0x8] sm:$0xff] (!%p511_p13)  ;;  %4304 = vmatprep.subr.mxu0 (!%p511_p13), %v3921_v50  ;;  %vm1650_vm2 = vcmask (!%p511_p13), 1045504   ;;  %vm3720_vm3 = vcmask (!%p511_p13), 130048  }
  0x24   : > { %627 = vst.msk [vmem:[#allocation2 + $0x30] sm:$0xff] (!%p511_p13), %vm620_vm0, %v4678_v10  ;;  %628 = vst.msk [vmem:[#allocation2 + $0x38] sm:$0xff] (!%p511_p13), %vm620_vm0, %v4678_v10  ;;  %v645_v14 = vld [vmem:[%s519_s18 + $0x10] sm:$0xff] (!%p511_p13)  ;;  %v658_v15 = vmul.f32 (!%p511_p13), %v4822_v9, %v643_v12  ;;  %v659_v16 = vmul.f32 (!%p511_p13), %v4822_v9, %v644_v13  ;;  %v646_v18 = vld [vmem:[%s519_s18 + $0x18] sm:$0xff] (!%p511_p13)  ;;  %s583_s15 = scalar_lea.vmem (!%p511_p13), [#allocation5], %s4817_s13  ;;  %s4084_s13 = sshll.u32 (!%p511_p13), %s4668_s22, 10 }
  0x25   : > { %629 = vst.msk [vmem:[#allocation2 + $0x40] sm:$0xff] (!%p511_p13), %vm620_vm0, %v4678_v10  ;;  %630 = vst.msk [vmem:[#allocation2 + $0x48] sm:$0xff] (!%p511_p13), %vm620_vm0, %v4678_v10  ;;  %v660_v17 = vmul.f32 (!%p511_p13), %v4822_v9, %v645_v14  ;;  %v647_v19 = vld [vmem:[%s519_s18 + $0x20] sm:$0xff] (!%p511_p13)  ;;  %v648_v20 = vld [vmem:[%s519_s18 + $0x28] sm:$0xff] (!%p511_p13)  ;;  %v661_v21 = vmul.f32 (!%p511_p13), %v4822_v9, %v646_v18  ;;  %s3745_s16 = sshll.u32 (!%p511_p13), %s583_s15, 4  ;;  %s5612_s25 = scalar_lea.hbm (!%p511_p13), %s5678_s12, %s4084_s13  ;;  %s5614_s16 = int_to_ptr.vmem [resolvable:$true] %s3745_s16 }
  0x26   : > { %631 = vst.msk [vmem:[#allocation2 + $0x50] sm:$0xff] (!%p511_p13), %vm620_vm0, %v4678_v10  ;;  %632 = vst.msk [vmem:[#allocation2 + $0x58] sm:$0xff] (!%p511_p13), %vm620_vm0, %v4678_v10  ;;  %v662_v22 = vmul.f32 (!%p511_p13), %v4822_v9, %v647_v19  ;;  %v663_v23 = vmul.f32 (!%p511_p13), %v4822_v9, %v648_v20  ;;  %v649_v24 = vld [vmem:[%s519_s18 + $0x30] sm:$0xff] (!%p511_p13)  ;;  %v650_v25 = vld [vmem:[%s519_s18 + $0x38] sm:$0xff] (!%p511_p13)  ;;  %v673_v26 = vadd.f32 (!%p511_p13), %v3884_v11, %v658_v15  ;;  %s5619_s22 = scalar_lea.sflag (!%p511_p13), [#allocation6], %s517_s1  ;;  %s4598_s26 = scalar_lea.vmem (!%p511_p13), %s5614_s16, 1024 }
  0x27   : > { %633 = vst.msk [vmem:[#allocation2 + $0x60] sm:$0xff] (!%p511_p13), %vm620_vm0, %v4678_v10  ;;  %634 = vst.msk [vmem:[#allocation2 + $0x68] sm:$0xff] (!%p511_p13), %vm620_vm0, %v4678_v10  ;;  %v674_v27 = vadd.f32 (!%p511_p13), %v3884_v11, %v659_v16  ;;  %v675_v28 = vadd.f32 (!%p511_p13), %v3884_v11, %v660_v17  ;;  %v664_v29 = vmul.f32 (!%p511_p13), %v4822_v9, %v649_v24  ;;  %v1144_v44 = vld [vmem:[%s5674_s8] sm:$0xff] (!%p511_p13)  ;;  %v4903_v52 = vld [vmem:[%s5674_s8 + $0x18] sm:$0xff] (!%p511_p13)  ;;  %p4599_p0 = scmp.ne.s32.totalorder (!%p511_p13), %s5614_s16, %s4598_s26  ;;  %s4679_s28 = smov (!%p511_p13), [#allocation5]  }
  0x28   : > { %635 = vst.msk [vmem:[#allocation2 + $0x70] sm:$0xff] %vm620_vm0, %v4678_v10  ;;  %636 = vst.msk [vmem:[#allocation2 + $0x78] sm:$0xff] %vm620_vm0, %v4678_v10  ;;  %v676_v30 = vadd.f32 %v3884_v11, %v661_v21  ;;  %v677_v31 = vadd.f32 %v3884_v11, %v662_v22  ;;  %v678_v32 = vadd.f32 %v3884_v11, %v663_v23  ;;  %v681_v34 = vmax.f32 %v673_v26, 0.0  ;;  %v4915_v56 = vld [vmem:[%s5674_s8 + $0x20] sm:$0xff]  ;;  %s4602_s14 = sshll.u32 %s4679_s28, 4  ;;  %s4603_s14 = int_to_ptr.vmem [resolvable:$false] %s4602_s14 }
  0x29   : > { %637 = vst.msk [vmem:[#allocation2 + $0x80] sm:$0xff] %vm620_vm0, %v4678_v10  ;;  %638 = vst.msk [vmem:[#allocation2 + $0x88] sm:$0xff] %vm620_vm0, %v4678_v10  ;;  %v665_v33 = vmul.f32 %v4822_v9, %v650_v25  ;;  %v682_v35 = vmax.f32 %v674_v27, 0.0  ;;  %v683_v36 = vmax.f32 %v675_v28, 0.0  ;;  %v679_v37 = vadd.f32 %v3884_v11, %v664_v29  ;;  %4278 = vmatprep.subr.mxu1 %v1144_v44  ;;  %v1111_v45 = vld [vmem:[#allocation2] sm:$0xff]  ;;  %v4885_v46 = vld [vmem:[#allocation2 + $0x8] sm:$0xff]  ;;  %p4600_p1 = pnand %p4599_p0, %p4786_p5  ;;  %p4605_p3 = scmp.lt.s32.totalorder %s5614_s16, %s4603_s14 }
  0x2a   : > { %639 = vst.msk [vmem:[#allocation2 + $0x90] sm:$0xff] %vm620_vm0, %v4678_v10  ;;  %640 = vst.msk [vmem:[#allocation2 + $0x98] sm:$0xff] %vm620_vm0, %v4678_v10  ;;  %v685_v38 = vmax.f32 %v677_v31, 0.0  ;;  %v686_v39 = vmax.f32 %v678_v32, 0.0  ;;  %4266 = vmatprep.mubr.msk.f32.mxu0 %vm620_vm0, %v681_v34  ;;  %v684_v42 = vmax.f32 %v676_v30, 0.0  ;;  %v1390_v48 = vrot.slane %v1111_v45, 1 }
  0x2b   : > { %641 = vst.msk [vmem:[#allocation2 + $0xa0] sm:$0xff] %vm620_vm0, %v4678_v10  ;;  %1095 = vst.msk [vmem:[#allocation3] sm:$0xff] %vm620_vm0, %v4678_v10  ;;  %v680_v40 = vadd.f32 %v3884_v11, %v665_v33  ;;  %v687_v41 = vmax.f32 %v679_v37, 0.0  ;;  %4267 = vmatmul.mubr.msk.f32.vlgmr.msra.gmra.mrb[0].mxu0 %vm620_vm0, %v682_v35  ;;  %v1391_v49 = vrot.slane %v4885_v46, 1  ;;  %v1651_v53 = vrot.slane %v1111_v45, 2  ;;  %p4601_p2 = pneg %p4600_p1  ;;  %s4604_s13 = scalar_lea.vmem %s4603_s14, 2048 }
  0x2c   : > { %1096 = vst.msk [vmem:[#allocation3 + $0x8] sm:$0xff] %vm620_vm0, %v4678_v10  ;;  %1097 = vst.msk [vmem:[#allocation3 + $0x10] sm:$0xff] %vm620_vm0, %v4678_v10  ;;  %4272 = vmatprep.mubr.msk.f32.mxu1 %vm620_vm0, %v685_v38  ;;  %4269 = vmatprep.mubr.msk.f32.mxu0 %vm620_vm0, %v683_v36  ;;  %v1652_v54 = vrot.slane %v4885_v46, 2  ;;  %v3893_v57 = vld [vmem:[%s5672_s6] ss:$0 sm:$0xff]  ;;  %v4958_v36 = vld [vmem:[%s5674_s8 + $0x28] sm:$0xff]  ;;  %p4606_p4 = scmp.lt.s32.totalorder %s4604_s13, %s4598_s26 }
  0x2d   : > { %1098 = vst.msk [vmem:[#allocation3 + $0x18] sm:$0xff] %vm620_vm0, %v4678_v10  ;;  %1099 = vst.msk [vmem:[#allocation3 + $0x20] sm:$0xff] %vm620_vm0, %v4678_v10  ;;  %4273 = vmatmul.mubr.msk.f32.vlgmr.msra.gmra.mrb[0].mxu1 %vm620_vm0, %v686_v39  ;;  %v688_v43 = vmax.f32 %v680_v40, 0.0  ;;  %v1392_v51 = vsel %vm1389_vm1, %v1390_v48, %v1391_v49  ;;  %4305 = vmatpush3.msra.mxu0 %v3921_v50  ;;  %v3894_v59 = vld [vmem:[%s5673_s7] ss:$0 sm:$0xff] }
  0x2e   : > { %1100 = vst.msk [vmem:[#allocation3 + $0x28] sm:$0xff] %vm620_vm0, %v4678_v10  ;;  %1101 = vst.msk [vmem:[#allocation3 + $0x30] sm:$0xff] %vm620_vm0, %v4678_v10  ;;  %4275 = vmatprep.mubr.msk.f32.mxu1 %vm620_vm0, %v687_v41  ;;  %4279 = vmatpush3.msra.mxu1 %v1144_v44  ;;  %v4910_v55 = vsel %vm1650_vm2, %v1651_v53, %v1652_v54  ;;  %p4607_p6 = por %p4606_p4, %p4605_p3 }
  0x2f   : > { %1102 = vst.msk [vmem:[#allocation3 + $0x38] sm:$0xff] %vm620_vm0, %v4678_v10  ;;  %1103 = vst.msk [vmem:[#allocation3 + $0x40] sm:$0xff] %vm620_vm0, %v4678_v10  ;;  %4270 = vmatmul.mubr.msk.f32.gmra.mrb[2].mxu0 %vm620_vm0, %v684_v42  ;;  %4330 = vmatprep.subr.mxu1 %v3938_v47 }
  0x30   : > { %1104 = vst.msk [vmem:[#allocation3 + $0x48] sm:$0xff] %vm620_vm0, %v4678_v10  ;;  %1105 = vst.msk [vmem:[#allocation3 + $0x50] sm:$0xff] %vm620_vm0, %v4678_v10  ;;  %4306 = vmatprep.mubr.msk.f32.mxu0 %vm620_vm0, %v1392_v51  ;;  %4356 = vmatprep.subr.mxu0 %v4903_v52  ;;  %p4608_p7 = pnand %p4607_p6, %p4601_p2 }
  0x31   : > { %1106 = vst.msk [vmem:[#allocation3 + $0x58] sm:$0xff] %vm620_vm0, %v4678_v10  ;;  %1107 = vst.msk [vmem:[#allocation3 + $0x60] sm:$0xff] %vm620_vm0, %v4678_v10  ;;  %4276 = vmatmul.mubr.msk.f32.gmra.mrb[2].mxu1 %vm620_vm0, %v688_v43 }
  0x32   : > { %1108 = vst.msk [vmem:[#allocation3 + $0x68] sm:$0xff] %vm620_vm0, %v4678_v10  ;;  %1109 = vst.msk [vmem:[#allocation3 + $0x70] sm:$0xff] %vm620_vm0, %v4678_v10  ;;  %4280 = vmatprep.mubr.msk.f32.mxu1 %vm620_vm0, %v1111_v45 }
  0x33   : > { %1110 = vst.msk [vmem:[#allocation3 + $0x78] sm:$0xff] %vm620_vm0, %v4678_v10 }
  0x35   : > { %4281 = vmatmul.mubr.msk.f32.vlgmr.msra.gmra.mrb[4].mxu1 %vm620_vm0, %v4885_v46 }
  0x36   : > { %4331 = vmatpush3.msra.mxu1 %v3938_v47 }
  0x37   : > { %4382 = vmatprep.subr.mxu1 %v4915_v56 }
  0xfe   : > { %v4268_v58 = vpop.f32.mrb[0].mxu0 }
  0xff   : > { %v827_v60 = vmul.f32 %v4268_v58, %v3893_v57  ;;  %v780_v61 = vpop.f32.mrb[1].mxu0 }
 0x100   : > { %v4274_v62 = vpop.f32.mrb[0].mxu1  ;;  %v826_v63 = vmul.f32 %v3893_v57, %v780_v61 }
 0x101   : > { %v831_v0 = vmul.f32 %v4274_v62, %v3893_v57  ;;  %v800_v1 = vpop.f32.mrb[1].mxu1  ;;  %v842_v2 = vadd.f32 %v3894_v59, %v827_v60 }
 0x102   : > { %v830_v3 = vmul.f32 %v3893_v57, %v800_v1  ;;  %v841_v4 = vadd.f32 %v3894_v59, %v826_v63  ;;  %v4271_v5 = vpop.f32.mrb[2].mxu0 }
 0x103   : > { %v846_v6 = vadd.f32 %v3894_v59, %v831_v0  ;;  %v850_v7 = vmax.f32 %v842_v2, 0.0  ;;  %v829_v8 = vmul.f32 %v4271_v5, %v3893_v57  ;;  %v790_v9 = vpop.f32.mrb[3].mxu0 }
 0x104   : > { %v845_v10 = vadd.f32 %v3894_v59, %v830_v3  ;;  %v4277_v11 = vpop.f32.mrb[2].mxu1  ;;  %v849_v12 = vmax.f32 %v841_v4, 0.0  ;;  %v828_v13 = vmul.f32 %v3893_v57, %v790_v9 }
 0x105   : > { %v854_v14 = vmax.f32 %v846_v6, 0.0  ;;  %v833_v15 = vmul.f32 %v4277_v11, %v3893_v57  ;;  %v810_v16 = vpop.f32.mrb[3].mxu1  ;;  %859 = vst.msk [vmem:[#allocation2 + $0x21] sm:$0xff] %vm620_vm0, %v850_v7  ;;  %v844_v17 = vadd.f32 %v3894_v59, %v829_v8 }
 0x106   : > { %v853_v18 = vmax.f32 %v845_v10, 0.0  ;;  %v832_v19 = vmul.f32 %v3893_v57, %v810_v16  ;;  %858 = vst.msk [vmem:[#allocation2 + $0x11] sm:$0xff] %vm620_vm0, %v849_v12  ;;  %v843_v20 = vadd.f32 %v3894_v59, %v828_v13 }
 0x107   : > { %863 = vst.msk [vmem:[#allocation2 + $0x61] sm:$0xff] %vm620_vm0, %v854_v14  ;;  %v848_v21 = vadd.f32 %v3894_v59, %v833_v15  ;;  %v852_v22 = vmax.f32 %v844_v17, 0.0 }
 0x108   : > { %862 = vst.msk [vmem:[#allocation2 + $0x51] sm:$0xff] %vm620_vm0, %v853_v18  ;;  %v847_v23 = vadd.f32 %v3894_v59, %v832_v19  ;;  %v851_v24 = vmax.f32 %v843_v20, 0.0  ;;  %v4023_v20 = vld [vmem:[%s5674_s8 + $0x38] sm:$0xff] }
 0x109   : > { %v856_v25 = vmax.f32 %v848_v21, 0.0  ;;  %861 = vst.msk [vmem:[#allocation2 + $0x41] sm:$0xff] %vm620_vm0, %v852_v22 }
 0x10a   : > { %v855_v26 = vmax.f32 %v847_v23, 0.0  ;;  %860 = vst.msk [vmem:[#allocation2 + $0x31] sm:$0xff] %vm620_vm0, %v851_v24 }
 0x10b   : > { %865 = vst.msk [vmem:[#allocation2 + $0x81] sm:$0xff] %vm620_vm0, %v856_v25 }
 0x10c   : > { %864 = vst.msk [vmem:[#allocation2 + $0x71] sm:$0xff] %vm620_vm0, %v855_v26  ;;  %v4936_v29 = vld [vmem:[#allocation2 + $0x20] sm:$0xff]  ;;  %v4942_v32 = vld [vmem:[#allocation2 + $0x28] sm:$0xff] }
 0x10d   : > { %v4932_v27 = vld [vmem:[#allocation2 + $0x10] sm:$0xff]  ;;  %v4934_v28 = vld [vmem:[#allocation2 + $0x18] sm:$0xff]  ;;  %v1397_v33 = vrot.slane %v4936_v29, 1  ;;  %v1399_v37 = vrot.slane %v4942_v32, 1  ;;  %v1658_v14 = vrot.slane %v4936_v29, 2  ;;  %v1660_v16 = vrot.slane %v4942_v32, 2 }
 0x10e   : > { %4283 = vmatprep.mubr.msk.f32.mxu1 %vm620_vm0, %v4932_v27  ;;  %v1393_v30 = vrot.slane %v4932_v27, 1  ;;  %v1395_v31 = vrot.slane %v4934_v28, 1  ;;  %v5024_v60 = vld [vmem:[#allocation2 + $0x60] sm:$0xff]  ;;  %v5028_v61 = vld [vmem:[#allocation2 + $0x68] sm:$0xff]  ;;  %v1654_v9 = vrot.slane %v4932_v27, 2  ;;  %v1656_v10 = vrot.slane %v4934_v28, 2 }
 0x10f   : > { %4284 = vmatmul.mubr.msk.f32.gmra.mrb[6].mxu1 %vm620_vm0, %v4934_v28  ;;  %v4981_v42 = vsel %vm1389_vm1, %v1397_v33, %v1399_v37  ;;  %v5004_v51 = vld [vmem:[#allocation2 + $0x50] sm:$0xff]  ;;  %v1413_v62 = vrot.slane %v5024_v60, 1  ;;  %v1415_v1 = vrot.slane %v5028_v61, 1  ;;  %v5120_v19 = vsel %vm1650_vm2, %v1658_v14, %v1660_v16 }
 0x110   : > { %4286 = vmatprep.mubr.msk.f32.mxu1 %vm620_vm0, %v4936_v29  ;;  %v1394_v34 = vsel %vm1389_vm1, %v1391_v49, %v1393_v30  ;;  %v4953_v35 = vsel %vm1389_vm1, %v1393_v30, %v1395_v31  ;;  %v4976_v41 = vsel %vm1389_vm1, %v1395_v31, %v1397_v33  ;;  %v4984_v44 = vld [vmem:[#allocation2 + $0x40] sm:$0xff]  ;;  %v4988_v45 = vld [vmem:[#allocation2 + $0x48] sm:$0xff]  ;;  %v1409_v53 = vrot.slane %v5004_v51, 1 }
 0x111   : > { %4307 = vmatmul.mubr.msk.f32.vlgmr.msra.gmra.mrb[4].mxu0 %vm620_vm0, %v1394_v34  ;;  %v4962_v38 = vld [vmem:[#allocation2 + $0x30] sm:$0xff]  ;;  %v4966_v39 = vld [vmem:[#allocation2 + $0x38] sm:$0xff]  ;;  %v1405_v47 = vrot.slane %v4984_v44, 1  ;;  %v1407_v50 = vrot.slane %v4988_v45, 1  ;;  %v5061_v6 = vsel %vm1389_vm1, %v1413_v62, %v1415_v1  ;;  %v1655_v15 = vsel %vm1650_vm2, %v1652_v54, %v1654_v9 }
 0x112   : > { %4309 = vmatprep.mubr.msk.f32.mxu0 %vm620_vm0, %v4953_v35  ;;  %4357 = vmatpush3.msra.mxu0 %v4903_v52  ;;  %v1401_v40 = vrot.slane %v4962_v38, 1  ;;  %v1403_v43 = vrot.slane %v4966_v39, 1  ;;  %v5008_v52 = vld [vmem:[#allocation2 + $0x58] sm:$0xff]  ;;  %v5064_v8 = vld [vmem:[#allocation2 + $0x80] sm:$0xff]  ;;  %v5097_v17 = vsel %vm1650_vm2, %v1654_v9, %v1656_v10  ;;  %v1662_v54 = vrot.slane %v4962_v38, 2 }
 0x113   : > { %4287 = vmatmul.mubr.msk.f32.gmra.mrb[8].mxu1 %vm620_vm0, %v4942_v32  ;;  %4408 = vmatprep.subr.mxu0 %v4958_v36  ;;  %v5021_v58 = vsel %vm1389_vm1, %v1405_v47, %v1407_v50  ;;  %v1411_v59 = vrot.slane %v5008_v52, 1  ;;  %v5036_v63 = vsel %vm1389_vm1, %v1407_v50, %v1409_v53  ;;  %v5044_v2 = vld [vmem:[#allocation2 + $0x70] sm:$0xff]  ;;  %v5048_v3 = vld [vmem:[#allocation2 + $0x78] sm:$0xff]  ;;  %v1421_v12 = vrot.slane %v5064_v8, 1 }
 0x114   : > { %4289 = vmatprep.mubr.msk.f32.mxu1 %vm620_vm0, %v4962_v38  ;;  %v4996_v48 = vsel %vm1389_vm1, %v1399_v37, %v1401_v40  ;;  %v5001_v49 = vsel %vm1389_vm1, %v1401_v40, %v1403_v43  ;;  %v5016_v57 = vsel %vm1389_vm1, %v1403_v43, %v1405_v47  ;;  %v1417_v4 = vrot.slane %v5044_v2, 1 }
 0x115   : > { %4310 = vmatmul.mubr.msk.f32.gmra.mrb[6].mxu0 %vm620_vm0, %v4976_v41  ;;  %v5041_v0 = vsel %vm1389_vm1, %v1409_v53, %v1411_v59  ;;  %v5056_v5 = vsel %vm1389_vm1, %v1411_v59, %v1413_v62  ;;  %v1419_v7 = vrot.slane %v5048_v3, 1  ;;  %v1664_v18 = vrot.slane %v4966_v39, 2  ;;  %v4040_v62 = vld [vmem:[%s5674_s8 + $0x40] sm:$0xff] }
 0x116   : > { %4312 = vmatprep.mubr.msk.f32.mxu0 %vm620_vm0, %v4981_v42  ;;  %v5073_v11 = vsel %vm1389_vm1, %v1415_v1, %v1417_v4  ;;  %v1666_v21 = vrot.slane %v4984_v44, 2  ;;  %v5133_v22 = vsel %vm1650_vm2, %v1660_v16, %v1662_v54  ;;  %v1668_v23 = vrot.slane %v4988_v45, 2  ;;  %v5232_v1 = vld [vmem:[#allocation2 + $0x88] sm:$0xff] }
 0x117   : > { %4290 = vmatmul.mubr.msk.f32.gmra.mrb[10].mxu1 %vm620_vm0, %v4966_v39  ;;  %v5081_v13 = vsel %vm1389_vm1, %v1417_v4, %v1419_v7  ;;  %v5105_v46 = vsel %vm1389_vm1, %v1419_v7, %v1421_v12  ;;  %v5140_v24 = vsel %vm1650_vm2, %v1662_v54, %v1664_v18  ;;  %v1670_v25 = vrot.slane %v5004_v51, 2  ;;  %v4282_v4 = vpop.f32.mrb[4].mxu1 }
 0x118   : > { %4292 = vmatprep.mubr.msk.f32.mxu1 %vm620_vm0, %v4984_v44  ;;  %v5150_v26 = vsel %vm1650_vm2, %v1664_v18, %v1666_v21  ;;  %v1674_v30 = vrot.slane %v5024_v60, 2  ;;  %v1676_v33 = vrot.slane %v5028_v61, 2  ;;  %v1680_v40 = vrot.slane %v5048_v3, 2  ;;  %v1259_v9 = vpop.f32.mrb[5].mxu1 }
 0x119   : > { %4313 = vmatmul.mubr.msk.f32.gmra.mrb[8].mxu0 %vm620_vm0, %v4996_v48  ;;  %v5166_v31 = vsel %vm1650_vm2, %v1668_v23, %v1670_v25  ;;  %v1682_v50 = vrot.slane %v5064_v8, 2 }
 0x11a   : > { %4315 = vmatprep.mubr.msk.f32.mxu0 %vm620_vm0, %v5001_v49  ;;  %v5188_v43 = vsel %vm1650_vm2, %v1674_v30, %v1676_v33 }
 0x11b   : > { %4293 = vmatmul.mubr.msk.f32.gmra.mrb[12].mxu1 %vm620_vm0, %v4988_v45  ;;  %v5214_v59 = vsel %vm1650_vm2, %v1680_v40, %v1682_v50 }
 0x11c   : > { %4295 = vmatprep.mubr.msk.f32.mxu1 %vm620_vm0, %v5004_v51 }
 0x11d   : > { %4316 = vmatmul.mubr.msk.f32.gmra.mrb[10].mxu0 %vm620_vm0, %v5016_v57 }
 0x11e   : > { %4318 = vmatprep.mubr.msk.f32.mxu0 %vm620_vm0, %v5021_v58 }
 0x11f   : > { %4296 = vmatmul.mubr.msk.f32.gmra.mrb[14].mxu1 %vm620_vm0, %v5008_v52 }
 0x120   : > { %4298 = vmatprep.mubr.msk.f32.mxu1 %vm620_vm0, %v5024_v60 }
 0x121   : > { %4319 = vmatmul.mubr.msk.f32.gmra.mrb[12].mxu0 %vm620_vm0, %v5036_v63 }
 0x122   : > { %4321 = vmatprep.mubr.msk.f32.mxu0 %vm620_vm0, %v5041_v0 }
 0x123   : > { %4299 = vmatmul.mubr.msk.f32.gmra.mrb[16].mxu1 %vm620_vm0, %v5028_v61 }
 0x124   : > { %4301 = vmatprep.mubr.msk.f32.mxu1 %vm620_vm0, %v5044_v2 }
 0x125   : > { %4322 = vmatmul.mubr.msk.f32.gmra.mrb[14].mxu0 %vm620_vm0, %v5056_v5 }
 0x126   : > { %4324 = vmatprep.mubr.msk.f32.mxu0 %vm620_vm0, %v5061_v6 }
 0x127   : > { %4302 = vmatmul.mubr.msk.f32.gmra.mrb[18].mxu1 %vm620_vm0, %v5048_v3 }
 0x128   : > { %4332 = vmatprep.mubr.msk.f32.mxu1 %vm620_vm0, %v4910_v55  ;;  %v5092_v55 = vld [vmem:[%s5674_s8 + $0x30] sm:$0xff] }
 0x129   : > { %4325 = vmatmul.mubr.msk.f32.gmra.mrb[16].mxu0 %vm620_vm0, %v5073_v11 }
 0x12a   : > { %4327 = vmatprep.mubr.msk.f32.mxu0 %vm620_vm0, %v5081_v13 }
 0x12b   : > { %4333 = vmatmul.mubr.msk.f32.vlgmr.msra.gmra.mrb[20].mxu1 %vm620_vm0, %v1655_v15  ;;  %v5275_v15 = vld [vmem:[#allocation2 + $0x90] sm:$0xff] }
 0x12c   : > { %4383 = vmatpush3.msra.mxu1 %v4915_v56  ;;  %4335 = vmatprep.mubr.msk.f32.mxu1 %vm620_vm0, %v5097_v17  ;;  %v5114_v56 = vsel %vm1650_vm2, %v1656_v10, %v1658_v14  ;;  %v2201_v14 = vrot.slane %v5232_v1, 1 }
 0x12d   : > { %4328 = vmatmul.mubr.msk.f32.gmra.mrb[18].mxu0 %vm620_vm0, %v5105_v46  ;;  %4434 = vmatprep.subr.mxu1 %v5092_v55 }
 0x12e   : > { %4358 = vmatprep.mubr.msk.f32.mxu0 %vm620_vm0, %v4932_v27  ;;  %v1672_v27 = vrot.slane %v5008_v52, 2  ;;  %v2202_v16 = vsel %vm1389_vm1, %v1421_v12, %v2201_v14 }
 0x12f   : > { %4336 = vmatmul.mubr.msk.f32.gmra.mrb[22].mxu1 %vm620_vm0, %v5114_v56 }
 0x130   : > { %4338 = vmatprep.mubr.msk.f32.mxu1 %vm620_vm0, %v5120_v19  ;;  %v5172_v34 = vsel %vm1650_vm2, %v1670_v25, %v1672_v27  ;;  %v5182_v37 = vsel %vm1650_vm2, %v1672_v27, %v1674_v30 }
 0x131   : > { %4359 = vmatmul.mubr.msk.f32.vlgmr.msra.gmra.mrb[20].mxu0 %vm620_vm0, %v4934_v28  ;;  %v5156_v28 = vsel %vm1650_vm2, %v1666_v21, %v1668_v23 }
 0x132   : > { %4361 = vmatprep.mubr.msk.f32.mxu0 %vm620_vm0, %v4936_v29  ;;  %4409 = vmatpush3.msra.mxu0 %v4958_v36  ;;  %v1678_v36 = vrot.slane %v5044_v2, 2 }
 0x133   : > { %4339 = vmatmul.mubr.msk.f32.gmra.mrb[24].mxu1 %vm620_vm0, %v5133_v22  ;;  %4460 = vmatprep.subr.mxu0 %v4023_v20 }
 0x134   : > { %4341 = vmatprep.mubr.msk.f32.mxu1 %vm620_vm0, %v5140_v24  ;;  %v5197_v47 = vsel %vm1650_vm2, %v1676_v33, %v1678_v36  ;;  %v5203_v53 = vsel %vm1650_vm2, %v1678_v36, %v1680_v40  ;;  %v1137_v36 = vld [vmem:[#allocation3 + $0x48] sm:$0xff] }
 0x135   : > { %4362 = vmatmul.mubr.msk.f32.gmra.mrb[22].mxu0 %vm620_vm0, %v4942_v32 }
 0x136   : > { %4364 = vmatprep.mubr.msk.f32.mxu0 %vm620_vm0, %v4962_v38 }
 0x137   : > { %4342 = vmatmul.mubr.msk.f32.gmra.mrb[26].mxu1 %vm620_vm0, %v5150_v26 }
 0x138   : > { %4344 = vmatprep.mubr.msk.f32.mxu1 %vm620_vm0, %v5156_v28 }
 0x139   : > { %4365 = vmatmul.mubr.msk.f32.gmra.mrb[24].mxu0 %vm620_vm0, %v4966_v39 }
 0x13a   : > { %4367 = vmatprep.mubr.msk.f32.mxu0 %vm620_vm0, %v4984_v44 }
 0x13b   : > { %4345 = vmatmul.mubr.msk.f32.gmra.mrb[28].mxu1 %vm620_vm0, %v5166_v31 }
 0x13c   : > { %4347 = vmatprep.mubr.msk.f32.mxu1 %vm620_vm0, %v5172_v34 }
 0x13d   : > { %4368 = vmatmul.mubr.msk.f32.gmra.mrb[26].mxu0 %vm620_vm0, %v4988_v45 }
 0x13e   : > { %4370 = vmatprep.mubr.msk.f32.mxu0 %vm620_vm0, %v5004_v51 }
 0x13f   : > { %4348 = vmatmul.mubr.msk.f32.gmra.mrb[30].mxu1 %vm620_vm0, %v5182_v37 }
 0x140   : > { %4350 = vmatprep.mubr.msk.f32.mxu1 %vm620_vm0, %v5188_v43 }
 0x141   : > { %4371 = vmatmul.mubr.msk.f32.gmra.mrb[28].mxu0 %vm620_vm0, %v5008_v52 }
 0x142   : > { %4373 = vmatprep.mubr.msk.f32.mxu0 %vm620_vm0, %v5024_v60 }
 0x143   : > { %4351 = vmatmul.mubr.msk.f32.gmra.mrb[32].mxu1 %vm620_vm0, %v5197_v47 }
 0x144   : > { %4353 = vmatprep.mubr.msk.f32.mxu1 %vm620_vm0, %v5203_v53 }
 0x145   : > { %4374 = vmatmul.mubr.msk.f32.gmra.mrb[30].mxu0 %vm620_vm0, %v5028_v61 }
 0x146   : > { %4376 = vmatprep.mubr.msk.f32.mxu0 %vm620_vm0, %v5044_v2 }
 0x147   : > { %4354 = vmatmul.mubr.msk.f32.gmra.mrb[34].mxu1 %vm620_vm0, %v5214_v59 }
 0x148   : > { %4384 = vmatprep.mubr.msk.f32.mxu1 %vm620_vm0, %v4953_v35  ;;  %v1129_v35 = vld [vmem:[#allocation3 + $0x8] sm:$0xff] }
 0x149   : > { %4377 = vmatmul.mubr.msk.f32.gmra.mrb[32].mxu0 %vm620_vm0, %v5048_v3  ;;  %v1339_v7 = vadd.f32 %v4282_v4, %v1129_v35  ;;  %v1139_v4 = vld [vmem:[#allocation3 + $0x58] sm:$0xff] }
 0x14a   : > { %4379 = vmatprep.mubr.msk.f32.mxu0 %vm620_vm0, %v5064_v8 }
 0x14b   : > { %4385 = vmatmul.mubr.msk.f32.vlgmr.msra.gmra.mrb[36].mxu1 %vm620_vm0, %v4976_v41  ;;  %v1128_v41 = vld [vmem:[#allocation3] sm:$0xff]  ;;  %1355 = vst.msk [vmem:[#allocation3 + $0x8] sm:$0xff] %vm620_vm0, %v1339_v7 }
 0x14c   : > { %4435 = vmatpush3.msra.mxu1 %v5092_v55  ;;  %4387 = vmatprep.mubr.msk.f32.mxu1 %vm620_vm0, %v4981_v42  ;;  %v1338_v10 = vadd.f32 %v1259_v9, %v1128_v41  ;;  %v2203_v55 = vrot.slane %v5275_v15, 1 }
 0x14d   : > { %4380 = vmatmul.mubr.msk.f32.gmra.mrb[34].mxu0 %vm620_vm0, %v5232_v1  ;;  %4486 = vmatprep.subr.mxu1 %v4040_v62 }
 0x14e   : > { %4410 = vmatprep.mubr.msk.f32.mxu0 %vm620_vm0, %v5097_v17  ;;  %1354 = vst.msk [vmem:[#allocation3] sm:$0xff] %vm620_vm0, %v1338_v10  ;;  %v2461_v17 = vrot.slane %v5232_v1, 2  ;;  %v2204_v54 = vsel %vm1389_vm1, %v2201_v14, %v2203_v55  ;;  %v1138_v14 = vld [vmem:[#allocation3 + $0x50] sm:$0xff] }
 0x14f   : > { %4388 = vmatmul.mubr.msk.f32.gmra.mrb[38].mxu1 %vm620_vm0, %v4996_v48 }
 0x150   : > { %4390 = vmatprep.mubr.msk.f32.mxu1 %vm620_vm0, %v5001_v49  ;;  %v2462_v12 = vsel %vm1650_vm2, %v1682_v50, %v2461_v17 }
 0x151   : > { %4411 = vmatmul.mubr.msk.f32.vlgmr.msra.gmra.mrb[36].mxu0 %vm620_vm0, %v5114_v56  ;;  %v2463_v56 = vrot.slane %v5275_v15, 2 }
 0x152   : > { %4413 = vmatprep.mubr.msk.f32.mxu0 %vm620_vm0, %v5120_v19  ;;  %4461 = vmatpush3.msra.mxu0 %v4023_v20 }
 0x153   : > { %4391 = vmatmul.mubr.msk.f32.gmra.mrb[40].mxu1 %vm620_vm0, %v5016_v57 }
 0x154   : > { %4393 = vmatprep.mubr.msk.f32.mxu1 %vm620_vm0, %v5021_v58 }
 0x155   : > { %4414 = vmatmul.mubr.msk.f32.gmra.mrb[38].mxu0 %vm620_vm0, %v5133_v22 }
 0x156   : > { %4416 = vmatprep.mubr.msk.f32.mxu0 %vm620_vm0, %v5140_v24 }
 0x157   : > { %4394 = vmatmul.mubr.msk.f32.gmra.mrb[42].mxu1 %vm620_vm0, %v5036_v63 }
 0x158   : > { %4396 = vmatprep.mubr.msk.f32.mxu1 %vm620_vm0, %v5041_v0 }
 0x159   : > { %4417 = vmatmul.mubr.msk.f32.gmra.mrb[40].mxu0 %vm620_vm0, %v5150_v26 }
 0x15a   : > { %4419 = vmatprep.mubr.msk.f32.mxu0 %vm620_vm0, %v5156_v28 }
 0x15b   : > { %4397 = vmatmul.mubr.msk.f32.gmra.mrb[44].mxu1 %vm620_vm0, %v5056_v5 }
 0x15c   : > { %4399 = vmatprep.mubr.msk.f32.mxu1 %vm620_vm0, %v5061_v6 }
 0x15d   : > { %4420 = vmatmul.mubr.msk.f32.gmra.mrb[42].mxu0 %vm620_vm0, %v5166_v31 }
 0x15e   : > { %4422 = vmatprep.mubr.msk.f32.mxu0 %vm620_vm0, %v5172_v34 }
 0x15f   : > { %4400 = vmatmul.mubr.msk.f32.gmra.mrb[46].mxu1 %vm620_vm0, %v5073_v11 }
 0x160   : > { %4402 = vmatprep.mubr.msk.f32.mxu1 %vm620_vm0, %v5081_v13 }
 0x161   : > { %4423 = vmatmul.mubr.msk.f32.gmra.mrb[44].mxu0 %vm620_vm0, %v5182_v37 }
 0x162   : > { %4425 = vmatprep.mubr.msk.f32.mxu0 %vm620_vm0, %v5188_v43 }
 0x163   : > { %4403 = vmatmul.mubr.msk.f32.gmra.mrb[48].mxu1 %vm620_vm0, %v5105_v46 }
 0x164   : > { %4405 = vmatprep.mubr.msk.f32.mxu1 %vm620_vm0, %v2202_v16 }
 0x165   : > { %4426 = vmatmul.mubr.msk.f32.gmra.mrb[46].mxu0 %vm620_vm0, %v5197_v47 }
 0x166   : > { %4428 = vmatprep.mubr.msk.f32.mxu0 %vm620_vm0, %v5203_v53 }
 0x167   : > { %4406 = vmatmul.mubr.msk.f32.gmra.mrb[50].mxu1 %vm620_vm0, %v2204_v54 }
 0x168   : > { %4436 = vmatprep.mubr.msk.f32.mxu1 %vm620_vm0, %v4936_v29  ;;  %v2464_v29 = vsel %vm1650_vm2, %v2461_v17, %v2463_v56 }
 0x169   : > { %4429 = vmatmul.mubr.msk.f32.gmra.mrb[48].mxu0 %vm620_vm0, %v5214_v59 }
 0x16a   : > { %4431 = vmatprep.mubr.msk.f32.mxu0 %vm620_vm0, %v2462_v12 }
 0x16b   : > { %4437 = vmatmul.mubr.msk.f32.vlgmr.msra.gmra.mrb[52].mxu1 %vm620_vm0, %v4942_v32  ;;  %v2690_v32 = vld [vmem:[#allocation2 + $0x98] sm:$0xff] }
 0x16c   : > { %4487 = vmatpush3.msra.mxu1 %v4040_v62  ;;  %4439 = vmatprep.mubr.msk.f32.mxu1 %vm620_vm0, %v4962_v38  ;;  %v2983_v38 = vrot.slane %v2690_v32, 1 }
 0x16d   : > { %4432 = vmatmul.mubr.msk.f32.gmra.mrb[50].mxu0 %vm620_vm0, %v2464_v29 }
 0x16e   : > { %4462 = vmatprep.mubr.msk.f32.mxu0 %vm620_vm0, %v4981_v42 }
 0x16f   : > { %4440 = vmatmul.mubr.msk.f32.gmra.mrb[54].mxu1 %vm620_vm0, %v4966_v39  ;;  %v2691_v39 = vld [vmem:[#allocation2 + $0xa0] sm:$0xff] }
 0x170   : > { %4442 = vmatprep.mubr.msk.f32.mxu1 %vm620_vm0, %v4984_v44  ;;  %v2985_v42 = vrot.slane %v2691_v39, 1  ;;  %v2984_v44 = vsel %vm1389_vm1, %v2203_v55, %v2983_v38 }
 0x171   : > { %4463 = vmatmul.mubr.msk.f32.vlgmr.msra.gmra.mrb[52].mxu0 %vm620_vm0, %v4996_v48  ;;  %v3243_v48 = vrot.slane %v2690_v32, 2 }
 0x172   : > { %4465 = vmatprep.mubr.msk.f32.mxu0 %vm620_vm0, %v5001_v49  ;;  %v3245_v49 = vrot.slane %v2691_v39, 2 }
 0x173   : > { %4443 = vmatmul.mubr.msk.f32.gmra.mrb[56].mxu1 %vm620_vm0, %v4988_v45  ;;  %v2986_v45 = vsel %vm1389_vm1, %v2983_v38, %v2985_v42  ;;  %v1140_v42 = vld [vmem:[#allocation3 + $0x60] sm:$0xff] }
 0x174   : > { %4445 = vmatprep.mubr.msk.f32.mxu1 %vm620_vm0, %v5004_v51  ;;  %v3244_v51 = vsel %vm1650_vm2, %v2463_v56, %v3243_v48 }
 0x175   : > { %4466 = vmatmul.mubr.msk.f32.gmra.mrb[54].mxu0 %vm620_vm0, %v5016_v57  ;;  %v3534_v57 = vld [vmem:[%s5677_s11] sm:$0xff] }
 0x176   : > { %4468 = vmatprep.mubr.msk.f32.mxu0 %vm620_vm0, %v5021_v58  ;;  %4512 = vmatprep.subr.mxu0 %v3534_v57  ;;  %v1131_v58 = vld [vmem:[#allocation3 + $0x18] sm:$0xff] }
 0x177   : > { %4446 = vmatmul.mubr.msk.f32.gmra.mrb[58].mxu1 %vm620_vm0, %v5008_v52  ;;  %v3246_v52 = vsel %vm1650_vm2, %v3243_v48, %v3245_v49  ;;  %4513 = vmatpush3.msra.mxu0 %v3534_v57 }
 0x178   : > { %4448 = vmatprep.mubr.msk.f32.mxu1 %vm620_vm0, %v5024_v60  ;;  %v1130_v60 = vld [vmem:[#allocation3 + $0x10] sm:$0xff] }
 0x179   : > { %4469 = vmatmul.mubr.msk.f32.gmra.mrb[56].mxu0 %vm620_vm0, %v5036_v63  ;;  %v1371_v63 = vld [vmem:[#allocation3 + $0x8] sm:$0xff] }
 0x17a   : > { %4471 = vmatprep.mubr.msk.f32.mxu0 %vm620_vm0, %v5041_v0 }
 0x17b   : > { %4449 = vmatmul.mubr.msk.f32.gmra.mrb[60].mxu1 %vm620_vm0, %v5028_v61 }
 0x17c   : > { %4451 = vmatprep.mubr.msk.f32.mxu1 %vm620_vm0, %v5044_v2 }
 0x17d   : > { %4472 = vmatmul.mubr.msk.f32.gmra.mrb[58].mxu0 %vm620_vm0, %v5056_v5 }
 0x17e   : > { %4474 = vmatprep.mubr.msk.f32.mxu0 %vm620_vm0, %v5061_v6 }
 0x17f   : > { %4452 = vmatmul.mubr.msk.f32.gmra.mrb[62].mxu1 %vm620_vm0, %v5048_v3  ;;  %v1370_v3 = vld [vmem:[#allocation3] sm:$0xff] }
 0x180   : > { %4454 = vmatprep.mubr.msk.f32.mxu1 %vm620_vm0, %v5064_v8  ;;  %v1133_v8 = vld [vmem:[#allocation3 + $0x28] sm:$0xff] }
 0x181   : > { %4475 = vmatmul.mubr.msk.f32.gmra.mrb[60].mxu0 %vm620_vm0, %v5073_v11 }
 0x182   : > { %4477 = vmatprep.mubr.msk.f32.mxu0 %vm620_vm0, %v5081_v13 }
 0x183   : > { %4455 = vmatmul.mubr.msk.f32.gmra.mrb[64].mxu1 %vm620_vm0, %v5232_v1 }
 0x184   : > { %4457 = vmatprep.mubr.msk.f32.mxu1 %vm620_vm0, %v5275_v15 }
 0x185   : > { %4478 = vmatmul.mubr.msk.f32.gmra.mrb[62].mxu0 %vm620_vm0, %v5105_v46  ;;  %v1132_v46 = vld [vmem:[#allocation3 + $0x20] sm:$0xff] }
 0x186   : > { %4480 = vmatprep.mubr.msk.f32.mxu0 %vm620_vm0, %v2202_v16 }
 0x187   : > { %4458 = vmatmul.mubr.msk.f32.gmra.mrb[66].mxu1 %vm620_vm0, %v2690_v32 }
 0x188   : > { %4488 = vmatprep.mubr.msk.f32.mxu1 %vm620_vm0, %v5120_v19 }
 0x189   : > { %4481 = vmatmul.mubr.msk.f32.gmra.mrb[64].mxu0 %vm620_vm0, %v2204_v54 }
 0x18a   : > { %4483 = vmatprep.mubr.msk.f32.mxu0 %vm620_vm0, %v2984_v44 }
 0x18b   : > { %4489 = vmatmul.mubr.msk.f32.vlgmr.msra.gmra.mrb[68].mxu1 %vm620_vm0, %v5133_v22 }
 0x18c   : > { %4491 = vmatprep.mubr.msk.f32.mxu1 %vm620_vm0, %v5140_v24  ;;  %v1135_v24 = vld [vmem:[#allocation3 + $0x38] sm:$0xff] }
 0x18d   : > { %4484 = vmatmul.mubr.msk.f32.gmra.mrb[66].mxu0 %vm620_vm0, %v2986_v45 }
 0x18f   : > { %4492 = vmatmul.mubr.msk.f32.gmra.mrb[70].mxu1 %vm620_vm0, %v5150_v26  ;;  %v1134_v26 = vld [vmem:[#allocation3 + $0x30] sm:$0xff] }
 0x190   : > { %4494 = vmatprep.mubr.msk.f32.mxu1 %vm620_vm0, %v5156_v28 }
 0x193   : > { %4495 = vmatmul.mubr.msk.f32.gmra.mrb[72].mxu1 %vm620_vm0, %v5166_v31 }
 0x194   : > { %4497 = vmatprep.mubr.msk.f32.mxu1 %vm620_vm0, %v5172_v34 }
 0x197   : > { %4498 = vmatmul.mubr.msk.f32.gmra.mrb[74].mxu1 %vm620_vm0, %v5182_v37 }
 0x198   : > { %4500 = vmatprep.mubr.msk.f32.mxu1 %vm620_vm0, %v5188_v43 }
 0x19b   : > { %4501 = vmatmul.mubr.msk.f32.gmra.mrb[76].mxu1 %vm620_vm0, %v5197_v47  ;;  %v1136_v47 = vld [vmem:[#allocation3 + $0x40] sm:$0xff] }
 0x19c   : > { %4503 = vmatprep.mubr.msk.f32.mxu1 %vm620_vm0, %v5203_v53 }
 0x19f   : > { %4504 = vmatmul.mubr.msk.f32.gmra.mrb[78].mxu1 %vm620_vm0, %v5214_v59 }
 0x1a0   : > { %4506 = vmatprep.mubr.msk.f32.mxu1 %vm620_vm0, %v2462_v12 }
 0x1a3   : > { %4507 = vmatmul.mubr.msk.f32.gmra.mrb[80].mxu1 %vm620_vm0, %v2464_v29  ;;  %v1141_v29 = vld [vmem:[#allocation3 + $0x68] sm:$0xff] }
 0x1a4   : > { %4509 = vmatprep.mubr.msk.f32.mxu1 %vm620_vm0, %v3244_v51 }
 0x1a7   : > { %4510 = vmatmul.mubr.msk.f32.gmra.mrb[82].mxu1 %vm620_vm0, %v3246_v52 }
 0x1e2   : > { %v4285_v61 = vpop.f32.mrb[6].mxu1 }
 0x1e3   : > { %v1341_v0 = vadd.f32 %v4285_v61, %v1131_v58  ;;  %v1269_v2 = vpop.f32.mrb[7].mxu1  ;;  %v1143_v58 = vld [vmem:[#allocation3 + $0x78] sm:$0xff] }
 0x1e4   : > { %v1340_v5 = vadd.f32 %v1269_v2, %v1130_v60  ;;  %v4308_v6 = vpop.f32.mrb[4].mxu0 }
 0x1e5   : > { %1357 = vst.msk [vmem:[#allocation3 + $0x18] sm:$0xff] %vm620_vm0, %v1341_v0  ;;  %v1601_v11 = vadd.f32 %v4308_v6, %v1371_v63  ;;  %v1521_v13 = vpop.f32.mrb[5].mxu0  ;;  %v1142_v0 = vld [vmem:[#allocation3 + $0x70] sm:$0xff] }
 0x1e6   : > { %1356 = vst.msk [vmem:[#allocation3 + $0x10] sm:$0xff] %vm620_vm0, %v1340_v5  ;;  %v1600_v18 = vadd.f32 %v1521_v13, %v1370_v3  ;;  %v4288_v19 = vpop.f32.mrb[8].mxu1 }
 0x1e7   : > { %1617 = vst.msk [vmem:[#allocation3 + $0x8] sm:$0xff] %vm620_vm0, %v1601_v11  ;;  %v1343_v20 = vadd.f32 %v4288_v19, %v1133_v8  ;;  %v1279_v21 = vpop.f32.mrb[9].mxu1 }
 0x1e8   : > { %1616 = vst.msk [vmem:[#allocation3] sm:$0xff] %vm620_vm0, %v1600_v18  ;;  %v1342_v22 = vadd.f32 %v1279_v21, %v1132_v46  ;;  %v4311_v23 = vpop.f32.mrb[6].mxu0 }
 0x1e9   : > { %1359 = vst.msk [vmem:[#allocation3 + $0x28] sm:$0xff] %vm620_vm0, %v1343_v20  ;;  %v1531_v25 = vpop.f32.mrb[7].mxu0 }
 0x1ea   : > { %1358 = vst.msk [vmem:[#allocation3 + $0x20] sm:$0xff] %vm620_vm0, %v1342_v22  ;;  %v4291_v27 = vpop.f32.mrb[10].mxu1 }
 0x1eb   : > { %v1345_v28 = vadd.f32 %v4291_v27, %v1135_v24  ;;  %v1289_v30 = vpop.f32.mrb[11].mxu1 }
 0x1ec   : > { %v1373_v31 = vld [vmem:[#allocation3 + $0x18] sm:$0xff]  ;;  %v1344_v33 = vadd.f32 %v1289_v30, %v1134_v26  ;;  %v4314_v34 = vpop.f32.mrb[8].mxu0 }
 0x1ed   : > { %v1603_v37 = vadd.f32 %v4311_v23, %v1373_v31  ;;  %v1372_v40 = vld [vmem:[#allocation3 + $0x10] sm:$0xff]  ;;  %1361 = vst.msk [vmem:[#allocation3 + $0x38] sm:$0xff] %vm620_vm0, %v1345_v28  ;;  %v1541_v43 = vpop.f32.mrb[9].mxu0 }
 0x1ee   : > { %v1602_v50 = vadd.f32 %v1531_v25, %v1372_v40  ;;  %1360 = vst.msk [vmem:[#allocation3 + $0x30] sm:$0xff] %vm620_vm0, %v1344_v33  ;;  %v4294_v53 = vpop.f32.mrb[12].mxu1  ;;  %v1633_v21 = vld [vmem:[#allocation3 + $0x8] sm:$0xff] }
 0x1ef   : > { %1619 = vst.msk [vmem:[#allocation3 + $0x18] sm:$0xff] %vm620_vm0, %v1603_v37  ;;  %v1347_v59 = vadd.f32 %v4294_v53, %v1137_v36  ;;  %v1299_v62 = vpop.f32.mrb[13].mxu1  ;;  %v1632_v24 = vld [vmem:[#allocation3] sm:$0xff] }
 0x1f0   : > { %1618 = vst.msk [vmem:[#allocation3 + $0x10] sm:$0xff] %vm620_vm0, %v1602_v50  ;;  %v1375_v1 = vld [vmem:[#allocation3 + $0x28] sm:$0xff]  ;;  %v1346_v35 = vadd.f32 %v1299_v62, %v1136_v47  ;;  %v4317_v41 = vpop.f32.mrb[10].mxu0 }
 0x1f1   : > { %v1605_v7 = vadd.f32 %v4314_v34, %v1375_v1  ;;  %v1374_v9 = vld [vmem:[#allocation3 + $0x20] sm:$0xff]  ;;  %1363 = vst.msk [vmem:[#allocation3 + $0x48] sm:$0xff] %vm620_vm0, %v1347_v59  ;;  %v1551_v10 = vpop.f32.mrb[11].mxu0 }
 0x1f2   : > { %v1604_v15 = vadd.f32 %v1541_v43, %v1374_v9  ;;  %1362 = vst.msk [vmem:[#allocation3 + $0x40] sm:$0xff] %vm620_vm0, %v1346_v35  ;;  %v4297_v55 = vpop.f32.mrb[14].mxu1 }
 0x1f3   : > { %1621 = vst.msk [vmem:[#allocation3 + $0x28] sm:$0xff] %vm620_vm0, %v1605_v7  ;;  %v1349_v16 = vadd.f32 %v4297_v55, %v1139_v4  ;;  %v1309_v17 = vpop.f32.mrb[15].mxu1 }
 0x1f4   : > { %1620 = vst.msk [vmem:[#allocation3 + $0x20] sm:$0xff] %vm620_vm0, %v1604_v15  ;;  %v1377_v54 = vld [vmem:[#allocation3 + $0x38] sm:$0xff]  ;;  %v1348_v56 = vadd.f32 %v1309_v17, %v1138_v14  ;;  %v4320_v12 = vpop.f32.mrb[12].mxu0 }
 0x1f5   : > { %v1607_v32 = vadd.f32 %v4317_v41, %v1377_v54  ;;  %v1376_v38 = vld [vmem:[#allocation3 + $0x30] sm:$0xff]  ;;  %1365 = vst.msk [vmem:[#allocation3 + $0x58] sm:$0xff] %vm620_vm0, %v1349_v16  ;;  %v1561_v39 = vpop.f32.mrb[13].mxu0 }
 0x1f6   : > { %v1606_v44 = vadd.f32 %v1551_v10, %v1376_v38  ;;  %1364 = vst.msk [vmem:[#allocation3 + $0x50] sm:$0xff] %vm620_vm0, %v1348_v56  ;;  %v4300_v45 = vpop.f32.mrb[16].mxu1  ;;  %v1635_v36 = vld [vmem:[#allocation3 + $0x18] sm:$0xff] }
 0x1f7   : > { %1623 = vst.msk [vmem:[#allocation3 + $0x38] sm:$0xff] %vm620_vm0, %v1607_v32  ;;  %v1351_v48 = vadd.f32 %v4300_v45, %v1141_v29  ;;  %v1319_v49 = vpop.f32.mrb[17].mxu1  ;;  %v1634_v43 = vld [vmem:[#allocation3 + $0x10] sm:$0xff] }
 0x1f8   : > { %1622 = vst.msk [vmem:[#allocation3 + $0x30] sm:$0xff] %vm620_vm0, %v1606_v44  ;;  %v1379_v51 = vld [vmem:[#allocation3 + $0x48] sm:$0xff]  ;;  %v1350_v52 = vadd.f32 %v1319_v49, %v1140_v42  ;;  %v4323_v57 = vpop.f32.mrb[14].mxu0 }
 0x1f9   : > { %v1609_v60 = vadd.f32 %v4320_v12, %v1379_v51  ;;  %v1378_v61 = vld [vmem:[#allocation3 + $0x40] sm:$0xff]  ;;  %1367 = vst.msk [vmem:[#allocation3 + $0x68] sm:$0xff] %vm620_vm0, %v1351_v48  ;;  %v1571_v63 = vpop.f32.mrb[15].mxu0 }
 0x1fa   : > { %v1608_v2 = vadd.f32 %v1561_v39, %v1378_v61  ;;  %1366 = vst.msk [vmem:[#allocation3 + $0x60] sm:$0xff] %vm620_vm0, %v1350_v52  ;;  %v4303_v3 = vpop.f32.mrb[18].mxu1  ;;  %v1637_v4 = vld [vmem:[#allocation3 + $0x28] sm:$0xff] }
 0x1fb   : > { %1625 = vst.msk [vmem:[#allocation3 + $0x48] sm:$0xff] %vm620_vm0, %v1609_v60  ;;  %v1353_v5 = vadd.f32 %v4303_v3, %v1143_v58  ;;  %v1329_v6 = vpop.f32.mrb[19].mxu1  ;;  %v1636_v10 = vld [vmem:[#allocation3 + $0x20] sm:$0xff] }
 0x1fc   : > { %1624 = vst.msk [vmem:[#allocation3 + $0x40] sm:$0xff] %vm620_vm0, %v1608_v2  ;;  %v1381_v8 = vld [vmem:[#allocation3 + $0x58] sm:$0xff]  ;;  %v1352_v11 = vadd.f32 %v1329_v6, %v1142_v0  ;;  %v4326_v13 = vpop.f32.mrb[16].mxu0 }
 0x1fd   : > { %v1611_v46 = vadd.f32 %v4323_v57, %v1381_v8  ;;  %v1380_v18 = vld [vmem:[#allocation3 + $0x50] sm:$0xff]  ;;  %1369 = vst.msk [vmem:[#allocation3 + $0x78] sm:$0xff] %vm620_vm0, %v1353_v5  ;;  %v1581_v19 = vpop.f32.mrb[17].mxu0 }
 0x1fe   : > { %v1610_v20 = vadd.f32 %v1571_v63, %v1380_v18  ;;  %1368 = vst.msk [vmem:[#allocation3 + $0x70] sm:$0xff] %vm620_vm0, %v1352_v11  ;;  %v4334_v22 = vpop.f32.mrb[20].mxu1  ;;  %v1639_v29 = vld [vmem:[#allocation3 + $0x38] sm:$0xff] }
 0x1ff   : > { %1627 = vst.msk [vmem:[#allocation3 + $0x58] sm:$0xff] %vm620_vm0, %v1611_v46  ;;  %v1862_v23 = vadd.f32 %v4334_v22, %v1633_v21  ;;  %v1782_v25 = vpop.f32.mrb[21].mxu1  ;;  %v1638_v39 = vld [vmem:[#allocation3 + $0x30] sm:$0xff] }
 0x200   : > { %1626 = vst.msk [vmem:[#allocation3 + $0x50] sm:$0xff] %vm620_vm0, %v1610_v20  ;;  %v1383_v26 = vld [vmem:[#allocation3 + $0x68] sm:$0xff]  ;;  %v1861_v27 = vadd.f32 %v1782_v25, %v1632_v24  ;;  %v4329_v28 = vpop.f32.mrb[18].mxu0 }
 0x201   : > { %v1613_v30 = vadd.f32 %v4326_v13, %v1383_v26  ;;  %v1382_v31 = vld [vmem:[#allocation3 + $0x60] sm:$0xff]  ;;  %1878 = vst.msk [vmem:[#allocation3 + $0x8] sm:$0xff] %vm620_vm0, %v1862_v23  ;;  %v1591_v33 = vpop.f32.mrb[19].mxu0 }
 0x202   : > { %v1612_v34 = vadd.f32 %v1581_v19, %v1382_v31  ;;  %1877 = vst.msk [vmem:[#allocation3] sm:$0xff] %vm620_vm0, %v1861_v27  ;;  %v4337_v37 = vpop.f32.mrb[22].mxu1  ;;  %v1641_v58 = vld [vmem:[#allocation3 + $0x48] sm:$0xff] }
 0x203   : > { %1629 = vst.msk [vmem:[#allocation3 + $0x68] sm:$0xff] %vm620_vm0, %v1613_v30  ;;  %v1864_v40 = vadd.f32 %v4337_v37, %v1635_v36  ;;  %v1792_v47 = vpop.f32.mrb[23].mxu1  ;;  %v1640_v63 = vld [vmem:[#allocation3 + $0x40] sm:$0xff] }
 0x204   : > { %1628 = vst.msk [vmem:[#allocation3 + $0x60] sm:$0xff] %vm620_vm0, %v1612_v34  ;;  %v1385_v50 = vld [vmem:[#allocation3 + $0x78] sm:$0xff]  ;;  %v1863_v53 = vadd.f32 %v1792_v47, %v1634_v43  ;;  %v4360_v59 = vpop.f32.mrb[20].mxu0 }
 0x205   : > { %v1615_v62 = vadd.f32 %v4329_v28, %v1385_v50  ;;  %v1384_v1 = vld [vmem:[#allocation3 + $0x70] sm:$0xff]  ;;  %1880 = vst.msk [vmem:[#allocation3 + $0x18] sm:$0xff] %vm620_vm0, %v1864_v40  ;;  %v2042_v35 = vpop.f32.mrb[21].mxu0 }
 0x206   : > { %v1614_v41 = vadd.f32 %v1591_v33, %v1384_v1  ;;  %1879 = vst.msk [vmem:[#allocation3 + $0x10] sm:$0xff] %vm620_vm0, %v1863_v53  ;;  %v4340_v7 = vpop.f32.mrb[24].mxu1  ;;  %v1643_v46 = vld [vmem:[#allocation3 + $0x58] sm:$0xff] }
 0x207   : > { %1631 = vst.msk [vmem:[#allocation3 + $0x78] sm:$0xff] %vm620_vm0, %v1615_v62  ;;  %v1866_v9 = vadd.f32 %v4340_v7, %v1637_v4  ;;  %v1802_v14 = vpop.f32.mrb[25].mxu1  ;;  %v1642_v20 = vld [vmem:[#allocation3 + $0x50] sm:$0xff] }
 0x208   : > { %1630 = vst.msk [vmem:[#allocation3 + $0x70] sm:$0xff] %vm620_vm0, %v1614_v41  ;;  %v1911_v15 = vld [vmem:[#allocation3 + $0x8] sm:$0xff]  ;;  %v1865_v55 = vadd.f32 %v1802_v14, %v1636_v10  ;;  %v4363_v16 = vpop.f32.mrb[22].mxu0 }
 0x209   : > { %v2122_v17 = vadd.f32 %v4360_v59, %v1911_v15  ;;  %v1910_v54 = vld [vmem:[#allocation3] sm:$0xff]  ;;  %1882 = vst.msk [vmem:[#allocation3 + $0x28] sm:$0xff] %vm620_vm0, %v1866_v9  ;;  %v2052_v56 = vpop.f32.mrb[23].mxu0 }
 0x20a   : > { %v2121_v12 = vadd.f32 %v2042_v35, %v1910_v54  ;;  %1881 = vst.msk [vmem:[#allocation3 + $0x20] sm:$0xff] %vm620_vm0, %v1865_v55  ;;  %v4343_v32 = vpop.f32.mrb[26].mxu1  ;;  %v1645_v30 = vld [vmem:[#allocation3 + $0x68] sm:$0xff] }
 0x20b   : > { %2138 = vst.msk [vmem:[#allocation3 + $0x8] sm:$0xff] %vm620_vm0, %v2122_v17  ;;  %v1868_v38 = vadd.f32 %v4343_v32, %v1639_v29  ;;  %v1812_v42 = vpop.f32.mrb[27].mxu1  ;;  %v1644_v34 = vld [vmem:[#allocation3 + $0x60] sm:$0xff] }
 0x20c   : > { %2137 = vst.msk [vmem:[#allocation3] sm:$0xff] %vm620_vm0, %v2121_v12  ;;  %v1913_v44 = vld [vmem:[#allocation3 + $0x18] sm:$0xff]  ;;  %v1867_v45 = vadd.f32 %v1812_v42, %v1638_v39  ;;  %v4366_v48 = vpop.f32.mrb[24].mxu0 }
 0x20d   : > { %v2124_v49 = vadd.f32 %v4363_v16, %v1913_v44  ;;  %v1912_v51 = vld [vmem:[#allocation3 + $0x10] sm:$0xff]  ;;  %1884 = vst.msk [vmem:[#allocation3 + $0x38] sm:$0xff] %vm620_vm0, %v1868_v38  ;;  %v2062_v52 = vpop.f32.mrb[25].mxu0 }
 0x20e   : > { %v2123_v57 = vadd.f32 %v2052_v56, %v1912_v51  ;;  %1883 = vst.msk [vmem:[#allocation3 + $0x30] sm:$0xff] %vm620_vm0, %v1867_v45  ;;  %v4346_v60 = vpop.f32.mrb[28].mxu1  ;;  %v1647_v62 = vld [vmem:[#allocation3 + $0x78] sm:$0xff] }
 0x20f   : > { %2140 = vst.msk [vmem:[#allocation3 + $0x18] sm:$0xff] %vm620_vm0, %v2124_v49  ;;  %v1870_v61 = vadd.f32 %v4346_v60, %v1641_v58  ;;  %v1822_v0 = vpop.f32.mrb[29].mxu1  ;;  %v1646_v41 = vld [vmem:[#allocation3 + $0x70] sm:$0xff] }
 0x210   : > { %2139 = vst.msk [vmem:[#allocation3 + $0x10] sm:$0xff] %vm620_vm0, %v2123_v57  ;;  %v1915_v2 = vld [vmem:[#allocation3 + $0x28] sm:$0xff]  ;;  %v1869_v3 = vadd.f32 %v1822_v0, %v1640_v63  ;;  %v4369_v5 = vpop.f32.mrb[26].mxu0 }
 0x211   : > { %v2126_v6 = vadd.f32 %v4366_v48, %v1915_v2  ;;  %v1914_v8 = vld [vmem:[#allocation3 + $0x20] sm:$0xff]  ;;  %1886 = vst.msk [vmem:[#allocation3 + $0x48] sm:$0xff] %vm620_vm0, %v1870_v61  ;;  %v2072_v11 = vpop.f32.mrb[27].mxu0 }
 0x212   : > { %v2125_v13 = vadd.f32 %v2062_v52, %v1914_v8  ;;  %1885 = vst.msk [vmem:[#allocation3 + $0x40] sm:$0xff] %vm620_vm0, %v1869_v3  ;;  %v4349_v18 = vpop.f32.mrb[30].mxu1  ;;  %v2154_v17 = vld [vmem:[#allocation3 + $0x8] sm:$0xff] }
 0x213   : > { %2142 = vst.msk [vmem:[#allocation3 + $0x28] sm:$0xff] %vm620_vm0, %v2126_v6  ;;  %v1872_v19 = vadd.f32 %v4349_v18, %v1643_v46  ;;  %v1832_v21 = vpop.f32.mrb[31].mxu1  ;;  %v2153_v12 = vld [vmem:[#allocation3] sm:$0xff] }
 0x214   : > { %2141 = vst.msk [vmem:[#allocation3 + $0x20] sm:$0xff] %vm620_vm0, %v2125_v13  ;;  %v1917_v22 = vld [vmem:[#allocation3 + $0x38] sm:$0xff]  ;;  %v1871_v23 = vadd.f32 %v1832_v21, %v1642_v20  ;;  %v4372_v24 = vpop.f32.mrb[28].mxu0 }
 0x215   : > { %v2128_v25 = vadd.f32 %v4369_v5, %v1917_v22  ;;  %v1916_v26 = vld [vmem:[#allocation3 + $0x30] sm:$0xff]  ;;  %1888 = vst.msk [vmem:[#allocation3 + $0x58] sm:$0xff] %vm620_vm0, %v1872_v19  ;;  %v2082_v27 = vpop.f32.mrb[29].mxu0 }
 0x216   : > { %v2127_v28 = vadd.f32 %v2072_v11, %v1916_v26  ;;  %1887 = vst.msk [vmem:[#allocation3 + $0x50] sm:$0xff] %vm620_vm0, %v1871_v23  ;;  %v4352_v31 = vpop.f32.mrb[32].mxu1  ;;  %v2156_v49 = vld [vmem:[#allocation3 + $0x18] sm:$0xff] }
 0x217   : > { %2144 = vst.msk [vmem:[#allocation3 + $0x38] sm:$0xff] %vm620_vm0, %v2128_v25  ;;  %v1874_v33 = vadd.f32 %v4352_v31, %v1645_v30  ;;  %v1842_v36 = vpop.f32.mrb[33].mxu1  ;;  %v2155_v57 = vld [vmem:[#allocation3 + $0x10] sm:$0xff] }
 0x218   : > { %2143 = vst.msk [vmem:[#allocation3 + $0x30] sm:$0xff] %vm620_vm0, %v2127_v28  ;;  %v1919_v37 = vld [vmem:[#allocation3 + $0x48] sm:$0xff]  ;;  %v1873_v40 = vadd.f32 %v1842_v36, %v1644_v34  ;;  %v4375_v43 = vpop.f32.mrb[30].mxu0 }
 0x219   : > { %v2130_v47 = vadd.f32 %v4372_v24, %v1919_v37  ;;  %v1918_v50 = vld [vmem:[#allocation3 + $0x40] sm:$0xff]  ;;  %1890 = vst.msk [vmem:[#allocation3 + $0x68] sm:$0xff] %vm620_vm0, %v1874_v33  ;;  %v2092_v53 = vpop.f32.mrb[31].mxu0 }
 0x21a   : > { %v2129_v59 = vadd.f32 %v2082_v27, %v1918_v50  ;;  %1889 = vst.msk [vmem:[#allocation3 + $0x60] sm:$0xff] %vm620_vm0, %v1873_v40  ;;  %v4355_v1 = vpop.f32.mrb[34].mxu1  ;;  %v2158_v6 = vld [vmem:[#allocation3 + $0x28] sm:$0xff] }
 0x21b   : > { %2146 = vst.msk [vmem:[#allocation3 + $0x48] sm:$0xff] %vm620_vm0, %v2130_v47  ;;  %v1876_v35 = vadd.f32 %v4355_v1, %v1647_v62  ;;  %v1852_v4 = vpop.f32.mrb[35].mxu1  ;;  %v2157_v13 = vld [vmem:[#allocation3 + $0x20] sm:$0xff] }
 0x21c   : > { %2145 = vst.msk [vmem:[#allocation3 + $0x40] sm:$0xff] %vm620_vm0, %v2129_v59  ;;  %v1921_v7 = vld [vmem:[#allocation3 + $0x58] sm:$0xff]  ;;  %v1875_v9 = vadd.f32 %v1852_v4, %v1646_v41  ;;  %v4378_v10 = vpop.f32.mrb[32].mxu0 }
 0x21d   : > { %v2132_v14 = vadd.f32 %v4375_v43, %v1921_v7  ;;  %v1920_v15 = vld [vmem:[#allocation3 + $0x50] sm:$0xff]  ;;  %1892 = vst.msk [vmem:[#allocation3 + $0x78] sm:$0xff] %vm620_vm0, %v1876_v35  ;;  %v2102_v55 = vpop.f32.mrb[33].mxu0 }
 0x21e   : > { %v2131_v16 = vadd.f32 %v2092_v53, %v1920_v15  ;;  %1891 = vst.msk [vmem:[#allocation3 + $0x70] sm:$0xff] %vm620_vm0, %v1875_v9  ;;  %v4386_v54 = vpop.f32.mrb[36].mxu1  ;;  %v2160_v25 = vld [vmem:[#allocation3 + $0x38] sm:$0xff] }
 0x21f   : > { %2148 = vst.msk [vmem:[#allocation3 + $0x58] sm:$0xff] %vm620_vm0, %v2132_v14  ;;  %v2383_v56 = vadd.f32 %v4386_v54, %v2154_v17  ;;  %v2303_v29 = vpop.f32.mrb[37].mxu1  ;;  %v2159_v28 = vld [vmem:[#allocation3 + $0x30] sm:$0xff] }
 0x220   : > { %2147 = vst.msk [vmem:[#allocation3 + $0x50] sm:$0xff] %vm620_vm0, %v2131_v16  ;;  %v1923_v32 = vld [vmem:[#allocation3 + $0x68] sm:$0xff]  ;;  %v2382_v38 = vadd.f32 %v2303_v29, %v2153_v12  ;;  %v4381_v39 = vpop.f32.mrb[34].mxu0 }
 0x221   : > { %v2134_v42 = vadd.f32 %v4378_v10, %v1923_v32  ;;  %v1922_v44 = vld [vmem:[#allocation3 + $0x60] sm:$0xff]  ;;  %2399 = vst.msk [vmem:[#allocation3 + $0x8] sm:$0xff] %vm620_vm0, %v2383_v56  ;;  %v2112_v45 = vpop.f32.mrb[35].mxu0 }
 0x222   : > { %v2133_v48 = vadd.f32 %v2102_v55, %v1922_v44  ;;  %2398 = vst.msk [vmem:[#allocation3] sm:$0xff] %vm620_vm0, %v2382_v38  ;;  %v4389_v51 = vpop.f32.mrb[38].mxu1  ;;  %v2162_v47 = vld [vmem:[#allocation3 + $0x48] sm:$0xff] }
 0x223   : > { %2150 = vst.msk [vmem:[#allocation3 + $0x68] sm:$0xff] %vm620_vm0, %v2134_v42  ;;  %v2385_v52 = vadd.f32 %v4389_v51, %v2156_v49  ;;  %v2313_v58 = vpop.f32.mrb[39].mxu1  ;;  %v2161_v59 = vld [vmem:[#allocation3 + $0x40] sm:$0xff] }
 0x224   : > { %2149 = vst.msk [vmem:[#allocation3 + $0x60] sm:$0xff] %vm620_vm0, %v2133_v48  ;;  %v1925_v60 = vld [vmem:[#allocation3 + $0x78] sm:$0xff]  ;;  %v2384_v61 = vadd.f32 %v2313_v58, %v2155_v57  ;;  %v4412_v63 = vpop.f32.mrb[36].mxu0 }
 0x225   : > { %v2136_v0 = vadd.f32 %v4381_v39, %v1925_v60  ;;  %v1924_v2 = vld [vmem:[#allocation3 + $0x70] sm:$0xff]  ;;  %2401 = vst.msk [vmem:[#allocation3 + $0x18] sm:$0xff] %vm620_vm0, %v2385_v52  ;;  %v2563_v3 = vpop.f32.mrb[37].mxu0 }
 0x226   : > { %v2135_v5 = vadd.f32 %v2112_v45, %v1924_v2  ;;  %2400 = vst.msk [vmem:[#allocation3 + $0x10] sm:$0xff] %vm620_vm0, %v2384_v61  ;;  %v4392_v8 = vpop.f32.mrb[40].mxu1  ;;  %v2164_v14 = vld [vmem:[#allocation3 + $0x58] sm:$0xff] }
 0x227   : > { %2152 = vst.msk [vmem:[#allocation3 + $0x78] sm:$0xff] %vm620_vm0, %v2136_v0  ;;  %v2387_v11 = vadd.f32 %v4392_v8, %v2158_v6  ;;  %v2323_v46 = vpop.f32.mrb[41].mxu1  ;;  %v2163_v16 = vld [vmem:[#allocation3 + $0x50] sm:$0xff] }
 0x228   : > { %2151 = vst.msk [vmem:[#allocation3 + $0x70] sm:$0xff] %vm620_vm0, %v2135_v5  ;;  %v2415_v18 = vld [vmem:[#allocation3 + $0x8] sm:$0xff]  ;;  %v2386_v19 = vadd.f32 %v2323_v46, %v2157_v13  ;;  %v4415_v20 = vpop.f32.mrb[38].mxu0 }
 0x229   : > { %v2643_v21 = vadd.f32 %v4412_v63, %v2415_v18  ;;  %v2414_v22 = vld [vmem:[#allocation3] sm:$0xff]  ;;  %2403 = vst.msk [vmem:[#allocation3 + $0x28] sm:$0xff] %vm620_vm0, %v2387_v11  ;;  %v2573_v23 = vpop.f32.mrb[39].mxu0 }
 0x22a   : > { %v2642_v24 = vadd.f32 %v2563_v3, %v2414_v22  ;;  %2402 = vst.msk [vmem:[#allocation3 + $0x20] sm:$0xff] %vm620_vm0, %v2386_v19  ;;  %v4395_v26 = vpop.f32.mrb[42].mxu1  ;;  %v2166_v42 = vld [vmem:[#allocation3 + $0x68] sm:$0xff] }
 0x22b   : > { %2659 = vst.msk [vmem:[#allocation3 + $0x8] sm:$0xff] %vm620_vm0, %v2643_v21  ;;  %v2389_v27 = vadd.f32 %v4395_v26, %v2160_v25  ;;  %v2333_v30 = vpop.f32.mrb[43].mxu1  ;;  %v2165_v48 = vld [vmem:[#allocation3 + $0x60] sm:$0xff] }
 0x22c   : > { %2658 = vst.msk [vmem:[#allocation3] sm:$0xff] %vm620_vm0, %v2642_v24  ;;  %v2417_v31 = vld [vmem:[#allocation3 + $0x18] sm:$0xff]  ;;  %v2388_v33 = vadd.f32 %v2333_v30, %v2159_v28  ;;  %v4418_v34 = vpop.f32.mrb[40].mxu0 }
 0x22d   : > { %v2645_v36 = vadd.f32 %v4415_v20, %v2417_v31  ;;  %v2416_v37 = vld [vmem:[#allocation3 + $0x10] sm:$0xff]  ;;  %2405 = vst.msk [vmem:[#allocation3 + $0x38] sm:$0xff] %vm620_vm0, %v2389_v27  ;;  %v2583_v40 = vpop.f32.mrb[41].mxu0 }
 0x22e   : > { %v2644_v43 = vadd.f32 %v2573_v23, %v2416_v37  ;;  %2404 = vst.msk [vmem:[#allocation3 + $0x30] sm:$0xff] %vm620_vm0, %v2388_v33  ;;  %v4398_v50 = vpop.f32.mrb[44].mxu1  ;;  %v2168_v0 = vld [vmem:[#allocation3 + $0x78] sm:$0xff] }
 0x22f   : > { %2661 = vst.msk [vmem:[#allocation3 + $0x18] sm:$0xff] %vm620_vm0, %v2645_v36  ;;  %v2391_v53 = vadd.f32 %v4398_v50, %v2162_v47  ;;  %v2343_v62 = vpop.f32.mrb[45].mxu1  ;;  %v2167_v5 = vld [vmem:[#allocation3 + $0x70] sm:$0xff] }
 0x230   : > { %2660 = vst.msk [vmem:[#allocation3 + $0x10] sm:$0xff] %vm620_vm0, %v2644_v43  ;;  %v2419_v1 = vld [vmem:[#allocation3 + $0x28] sm:$0xff]  ;;  %v2390_v35 = vadd.f32 %v2343_v62, %v2161_v59  ;;  %v4421_v41 = vpop.f32.mrb[42].mxu0 }
 0x231   : > { %v2647_v4 = vadd.f32 %v4418_v34, %v2419_v1  ;;  %v2418_v7 = vld [vmem:[#allocation3 + $0x20] sm:$0xff]  ;;  %2407 = vst.msk [vmem:[#allocation3 + $0x48] sm:$0xff] %vm620_vm0, %v2391_v53  ;;  %v2593_v9 = vpop.f32.mrb[43].mxu0 }
 0x232   : > { %v2646_v10 = vadd.f32 %v2583_v40, %v2418_v7  ;;  %2406 = vst.msk [vmem:[#allocation3 + $0x40] sm:$0xff] %vm620_vm0, %v2390_v35  ;;  %v4401_v15 = vpop.f32.mrb[46].mxu1  ;;  %v2693_v21 = vld [vmem:[#allocation3 + $0x8] sm:$0xff] }
 0x233   : > { %2663 = vst.msk [vmem:[#allocation3 + $0x28] sm:$0xff] %vm620_vm0, %v2647_v4  ;;  %v2393_v55 = vadd.f32 %v4401_v15, %v2164_v14  ;;  %v2353_v17 = vpop.f32.mrb[47].mxu1  ;;  %v2692_v24 = vld [vmem:[#allocation3] sm:$0xff] }
 0x234   : > { %2662 = vst.msk [vmem:[#allocation3 + $0x20] sm:$0xff] %vm620_vm0, %v2646_v10  ;;  %v2421_v54 = vld [vmem:[#allocation3 + $0x38] sm:$0xff]  ;;  %v2392_v56 = vadd.f32 %v2353_v17, %v2163_v16  ;;  %v4424_v12 = vpop.f32.mrb[44].mxu0 }
 0x235   : > { %v2649_v29 = vadd.f32 %v4421_v41, %v2421_v54  ;;  %v2420_v32 = vld [vmem:[#allocation3 + $0x30] sm:$0xff]  ;;  %2409 = vst.msk [vmem:[#allocation3 + $0x58] sm:$0xff] %vm620_vm0, %v2393_v55  ;;  %v2603_v38 = vpop.f32.mrb[45].mxu0 }
 0x236   : > { %v2648_v39 = vadd.f32 %v2593_v9, %v2420_v32  ;;  %2408 = vst.msk [vmem:[#allocation3 + $0x50] sm:$0xff] %vm620_vm0, %v2392_v56  ;;  %v4404_v44 = vpop.f32.mrb[48].mxu1  ;;  %v2695_v36 = vld [vmem:[#allocation3 + $0x18] sm:$0xff] }
 0x237   : > { %2665 = vst.msk [vmem:[#allocation3 + $0x38] sm:$0xff] %vm620_vm0, %v2649_v29  ;;  %v2395_v45 = vadd.f32 %v4404_v44, %v2166_v42  ;;  %v2363_v49 = vpop.f32.mrb[49].mxu1  ;;  %v2694_v43 = vld [vmem:[#allocation3 + $0x10] sm:$0xff] }
 0x238   : > { %2664 = vst.msk [vmem:[#allocation3 + $0x30] sm:$0xff] %vm620_vm0, %v2648_v39  ;;  %v2423_v51 = vld [vmem:[#allocation3 + $0x48] sm:$0xff]  ;;  %v2394_v52 = vadd.f32 %v2363_v49, %v2165_v48  ;;  %v4427_v57 = vpop.f32.mrb[46].mxu0 }
 0x239   : > { %v2651_v58 = vadd.f32 %v4424_v12, %v2423_v51  ;;  %v2422_v60 = vld [vmem:[#allocation3 + $0x40] sm:$0xff]  ;;  %2411 = vst.msk [vmem:[#allocation3 + $0x68] sm:$0xff] %vm620_vm0, %v2395_v45  ;;  %v2613_v61 = vpop.f32.mrb[47].mxu0 }
 0x23a   : > { %v2650_v63 = vadd.f32 %v2603_v38, %v2422_v60  ;;  %2410 = vst.msk [vmem:[#allocation3 + $0x60] sm:$0xff] %vm620_vm0, %v2394_v52  ;;  %v4407_v2 = vpop.f32.mrb[50].mxu1  ;;  %v2697_v4 = vld [vmem:[#allocation3 + $0x28] sm:$0xff] }
 0x23b   : > { %2667 = vst.msk [vmem:[#allocation3 + $0x48] sm:$0xff] %vm620_vm0, %v2651_v58  ;;  %v2397_v3 = vadd.f32 %v4407_v2, %v2168_v0  ;;  %v2373_v6 = vpop.f32.mrb[51].mxu1  ;;  %v2696_v10 = vld [vmem:[#allocation3 + $0x20] sm:$0xff] }
 0x23c   : > { %2666 = vst.msk [vmem:[#allocation3 + $0x40] sm:$0xff] %vm620_vm0, %v2650_v63  ;;  %v2425_v8 = vld [vmem:[#allocation3 + $0x58] sm:$0xff]  ;;  %v2396_v11 = vadd.f32 %v2373_v6, %v2167_v5  ;;  %v4430_v13 = vpop.f32.mrb[48].mxu0 }
 0x23d   : > { %v2653_v46 = vadd.f32 %v4427_v57, %v2425_v8  ;;  %v2424_v18 = vld [vmem:[#allocation3 + $0x50] sm:$0xff]  ;;  %2413 = vst.msk [vmem:[#allocation3 + $0x78] sm:$0xff] %vm620_vm0, %v2397_v3  ;;  %v2623_v19 = vpop.f32.mrb[49].mxu0 }
 0x23e   : > { %v2652_v20 = vadd.f32 %v2613_v61, %v2424_v18  ;;  %2412 = vst.msk [vmem:[#allocation3 + $0x70] sm:$0xff] %vm620_vm0, %v2396_v11  ;;  %v4438_v22 = vpop.f32.mrb[52].mxu1  ;;  %v2699_v29 = vld [vmem:[#allocation3 + $0x38] sm:$0xff] }
 0x23f   : > { %2669 = vst.msk [vmem:[#allocation3 + $0x58] sm:$0xff] %vm620_vm0, %v2653_v46  ;;  %v2904_v23 = vadd.f32 %v4438_v22, %v2693_v21  ;;  %v2824_v25 = vpop.f32.mrb[53].mxu1  ;;  %v2698_v39 = vld [vmem:[#allocation3 + $0x30] sm:$0xff] }
 0x240   : > { %2668 = vst.msk [vmem:[#allocation3 + $0x50] sm:$0xff] %vm620_vm0, %v2652_v20  ;;  %v2427_v26 = vld [vmem:[#allocation3 + $0x68] sm:$0xff]  ;;  %v2903_v27 = vadd.f32 %v2824_v25, %v2692_v24  ;;  %v4433_v28 = vpop.f32.mrb[50].mxu0 }
 0x241   : > { %v2655_v30 = vadd.f32 %v4430_v13, %v2427_v26  ;;  %v2426_v31 = vld [vmem:[#allocation3 + $0x60] sm:$0xff]  ;;  %2920 = vst.msk [vmem:[#allocation3 + $0x8] sm:$0xff] %vm620_vm0, %v2904_v23  ;;  %v2633_v33 = vpop.f32.mrb[51].mxu0 }
 0x242   : > { %v2654_v34 = vadd.f32 %v2623_v19, %v2426_v31  ;;  %2919 = vst.msk [vmem:[#allocation3] sm:$0xff] %vm620_vm0, %v2903_v27  ;;  %v4441_v37 = vpop.f32.mrb[54].mxu1  ;;  %v2701_v58 = vld [vmem:[#allocation3 + $0x48] sm:$0xff] }
 0x243   : > { %2671 = vst.msk [vmem:[#allocation3 + $0x68] sm:$0xff] %vm620_vm0, %v2655_v30  ;;  %v2906_v40 = vadd.f32 %v4441_v37, %v2695_v36  ;;  %v2834_v47 = vpop.f32.mrb[55].mxu1  ;;  %v2700_v63 = vld [vmem:[#allocation3 + $0x40] sm:$0xff] }
 0x244   : > { %2670 = vst.msk [vmem:[#allocation3 + $0x60] sm:$0xff] %vm620_vm0, %v2654_v34  ;;  %v2429_v50 = vld [vmem:[#allocation3 + $0x78] sm:$0xff]  ;;  %v2905_v53 = vadd.f32 %v2834_v47, %v2694_v43  ;;  %v4464_v59 = vpop.f32.mrb[52].mxu0 }
 0x245   : > { %v2657_v62 = vadd.f32 %v4433_v28, %v2429_v50  ;;  %v2428_v1 = vld [vmem:[#allocation3 + $0x70] sm:$0xff]  ;;  %2922 = vst.msk [vmem:[#allocation3 + $0x18] sm:$0xff] %vm620_vm0, %v2906_v40  ;;  %v3085_v35 = vpop.f32.mrb[53].mxu0 }
 0x246   : > { %v2656_v41 = vadd.f32 %v2633_v33, %v2428_v1  ;;  %2921 = vst.msk [vmem:[#allocation3 + $0x10] sm:$0xff] %vm620_vm0, %v2905_v53  ;;  %v4444_v7 = vpop.f32.mrb[56].mxu1  ;;  %v2703_v46 = vld [vmem:[#allocation3 + $0x58] sm:$0xff] }
 0x247   : > { %2673 = vst.msk [vmem:[#allocation3 + $0x78] sm:$0xff] %vm620_vm0, %v2657_v62  ;;  %v2908_v9 = vadd.f32 %v4444_v7, %v2697_v4  ;;  %v2844_v14 = vpop.f32.mrb[57].mxu1  ;;  %v2702_v20 = vld [vmem:[#allocation3 + $0x50] sm:$0xff] }
 0x248   : > { %2672 = vst.msk [vmem:[#allocation3 + $0x70] sm:$0xff] %vm620_vm0, %v2656_v41  ;;  %v2936_v15 = vld [vmem:[#allocation3 + $0x8] sm:$0xff]  ;;  %v2907_v55 = vadd.f32 %v2844_v14, %v2696_v10  ;;  %v4467_v16 = vpop.f32.mrb[54].mxu0 }
 0x249   : > { %v3165_v17 = vadd.f32 %v4464_v59, %v2936_v15  ;;  %v2935_v54 = vld [vmem:[#allocation3] sm:$0xff]  ;;  %2924 = vst.msk [vmem:[#allocation3 + $0x28] sm:$0xff] %vm620_vm0, %v2908_v9  ;;  %v3095_v56 = vpop.f32.mrb[55].mxu0 }
 0x24a   : > { %v3164_v12 = vadd.f32 %v3085_v35, %v2935_v54  ;;  %2923 = vst.msk [vmem:[#allocation3 + $0x20] sm:$0xff] %vm620_vm0, %v2907_v55  ;;  %v4447_v32 = vpop.f32.mrb[58].mxu1  ;;  %v2705_v30 = vld [vmem:[#allocation3 + $0x68] sm:$0xff] }
 0x24b   : > { %3181 = vst.msk [vmem:[#allocation3 + $0x8] sm:$0xff] %vm620_vm0, %v3165_v17  ;;  %v2910_v38 = vadd.f32 %v4447_v32, %v2699_v29  ;;  %v2854_v42 = vpop.f32.mrb[59].mxu1  ;;  %v2704_v34 = vld [vmem:[#allocation3 + $0x60] sm:$0xff] }
 0x24c   : > { %3180 = vst.msk [vmem:[#allocation3] sm:$0xff] %vm620_vm0, %v3164_v12  ;;  %v2938_v44 = vld [vmem:[#allocation3 + $0x18] sm:$0xff]  ;;  %v2909_v45 = vadd.f32 %v2854_v42, %v2698_v39  ;;  %v4470_v48 = vpop.f32.mrb[56].mxu0 }
 0x24d   : > { %v3167_v49 = vadd.f32 %v4467_v16, %v2938_v44  ;;  %v2937_v51 = vld [vmem:[#allocation3 + $0x10] sm:$0xff]  ;;  %2926 = vst.msk [vmem:[#allocation3 + $0x38] sm:$0xff] %vm620_vm0, %v2910_v38  ;;  %v3105_v52 = vpop.f32.mrb[57].mxu0 }
 0x24e   : > { %v3166_v57 = vadd.f32 %v3095_v56, %v2937_v51  ;;  %2925 = vst.msk [vmem:[#allocation3 + $0x30] sm:$0xff] %vm620_vm0, %v2909_v45  ;;  %v4450_v60 = vpop.f32.mrb[60].mxu1  ;;  %v2707_v62 = vld [vmem:[#allocation3 + $0x78] sm:$0xff] }
 0x24f   : > { %3183 = vst.msk [vmem:[#allocation3 + $0x18] sm:$0xff] %vm620_vm0, %v3167_v49  ;;  %v2912_v61 = vadd.f32 %v4450_v60, %v2701_v58  ;;  %v2864_v0 = vpop.f32.mrb[61].mxu1  ;;  %v2706_v41 = vld [vmem:[#allocation3 + $0x70] sm:$0xff] }
 0x250   : > { %3182 = vst.msk [vmem:[#allocation3 + $0x10] sm:$0xff] %vm620_vm0, %v3166_v57  ;;  %v2940_v2 = vld [vmem:[#allocation3 + $0x28] sm:$0xff]  ;;  %v2911_v3 = vadd.f32 %v2864_v0, %v2700_v63  ;;  %v4473_v5 = vpop.f32.mrb[58].mxu0 }
 0x251   : > { %v3169_v6 = vadd.f32 %v4470_v48, %v2940_v2  ;;  %v2939_v8 = vld [vmem:[#allocation3 + $0x20] sm:$0xff]  ;;  %2928 = vst.msk [vmem:[#allocation3 + $0x48] sm:$0xff] %vm620_vm0, %v2912_v61  ;;  %v3115_v11 = vpop.f32.mrb[59].mxu0 }
 0x252   : > { %v3168_v13 = vadd.f32 %v3105_v52, %v2939_v8  ;;  %2927 = vst.msk [vmem:[#allocation3 + $0x40] sm:$0xff] %vm620_vm0, %v2911_v3  ;;  %v4453_v18 = vpop.f32.mrb[62].mxu1  ;;  %v3197_v17 = vld [vmem:[#allocation3 + $0x8] sm:$0xff] }
 0x253   : > { %3185 = vst.msk [vmem:[#allocation3 + $0x28] sm:$0xff] %vm620_vm0, %v3169_v6  ;;  %v2914_v19 = vadd.f32 %v4453_v18, %v2703_v46  ;;  %v2874_v21 = vpop.f32.mrb[63].mxu1  ;;  %v3196_v12 = vld [vmem:[#allocation3] sm:$0xff]  ;;  %v5531_v6 = vld [vmem:[%s5675_s9] ss:$0 sm:$0xff] }
 0x254   : > { %3184 = vst.msk [vmem:[#allocation3 + $0x20] sm:$0xff] %vm620_vm0, %v3168_v13  ;;  %v2942_v22 = vld [vmem:[#allocation3 + $0x38] sm:$0xff]  ;;  %v2913_v23 = vadd.f32 %v2874_v21, %v2702_v20  ;;  %v4476_v24 = vpop.f32.mrb[60].mxu0  ;;  %v5538_v18 = vld [vmem:[%s5676_s10] ss:$0 sm:$0xff] }
 0x255   : > { %v3171_v25 = vadd.f32 %v4473_v5, %v2942_v22  ;;  %v2941_v26 = vld [vmem:[#allocation3 + $0x30] sm:$0xff]  ;;  %2930 = vst.msk [vmem:[#allocation3 + $0x58] sm:$0xff] %vm620_vm0, %v2914_v19  ;;  %v3125_v27 = vpop.f32.mrb[61].mxu0 }
 0x256   : > { %v3170_v28 = vadd.f32 %v3115_v11, %v2941_v26  ;;  %2929 = vst.msk [vmem:[#allocation3 + $0x50] sm:$0xff] %vm620_vm0, %v2913_v23  ;;  %v4456_v31 = vpop.f32.mrb[64].mxu1  ;;  %v3199_v49 = vld [vmem:[#allocation3 + $0x18] sm:$0xff] }
 0x257   : > { %3187 = vst.msk [vmem:[#allocation3 + $0x38] sm:$0xff] %vm620_vm0, %v3171_v25  ;;  %v2916_v33 = vadd.f32 %v4456_v31, %v2705_v30  ;;  %v2884_v36 = vpop.f32.mrb[65].mxu1  ;;  %v3198_v57 = vld [vmem:[#allocation3 + $0x10] sm:$0xff] }
 0x258   : > { %3186 = vst.msk [vmem:[#allocation3 + $0x30] sm:$0xff] %vm620_vm0, %v3170_v28  ;;  %v2944_v37 = vld [vmem:[#allocation3 + $0x48] sm:$0xff]  ;;  %v2915_v40 = vadd.f32 %v2884_v36, %v2704_v34  ;;  %v4479_v43 = vpop.f32.mrb[62].mxu0 }
 0x259   : > { %v3173_v47 = vadd.f32 %v4476_v24, %v2944_v37  ;;  %v2943_v50 = vld [vmem:[#allocation3 + $0x40] sm:$0xff]  ;;  %2932 = vst.msk [vmem:[#allocation3 + $0x68] sm:$0xff] %vm620_vm0, %v2916_v33  ;;  %v3135_v53 = vpop.f32.mrb[63].mxu0 }
 0x25a   : > { %v3172_v59 = vadd.f32 %v3125_v27, %v2943_v50  ;;  %2931 = vst.msk [vmem:[#allocation3 + $0x60] sm:$0xff] %vm620_vm0, %v2915_v40  ;;  %v4459_v1 = vpop.f32.mrb[66].mxu1  ;;  %v3201_v3 = vld [vmem:[#allocation3 + $0x28] sm:$0xff] }
 0x25b   : > { %3189 = vst.msk [vmem:[#allocation3 + $0x48] sm:$0xff] %vm620_vm0, %v3173_v47  ;;  %v2918_v35 = vadd.f32 %v4459_v1, %v2707_v62  ;;  %v2894_v4 = vpop.f32.mrb[67].mxu1  ;;  %v3200_v11 = vld [vmem:[#allocation3 + $0x20] sm:$0xff] }
 0x25c   : > { %3188 = vst.msk [vmem:[#allocation3 + $0x40] sm:$0xff] %vm620_vm0, %v3172_v59  ;;  %v2946_v7 = vld [vmem:[#allocation3 + $0x58] sm:$0xff]  ;;  %v2917_v9 = vadd.f32 %v2894_v4, %v2706_v41  ;;  %v4482_v10 = vpop.f32.mrb[64].mxu0 }
 0x25d   : > { %v3175_v14 = vadd.f32 %v4479_v43, %v2946_v7  ;;  %v2945_v15 = vld [vmem:[#allocation3 + $0x50] sm:$0xff]  ;;  %2934 = vst.msk [vmem:[#allocation3 + $0x78] sm:$0xff] %vm620_vm0, %v2918_v35  ;;  %v3145_v55 = vpop.f32.mrb[65].mxu0 }
 0x25e   : > { %v3174_v16 = vadd.f32 %v3135_v53, %v2945_v15  ;;  %2933 = vst.msk [vmem:[#allocation3 + $0x70] sm:$0xff] %vm620_vm0, %v2917_v9  ;;  %v4490_v54 = vpop.f32.mrb[68].mxu1  ;;  %v3203_v22 = vld [vmem:[#allocation3 + $0x38] sm:$0xff] }
 0x25f   : > { %3191 = vst.msk [vmem:[#allocation3 + $0x58] sm:$0xff] %vm620_vm0, %v3175_v14  ;;  %v3425_v56 = vadd.f32 %v4490_v54, %v3197_v17  ;;  %v3345_v29 = vpop.f32.mrb[69].mxu1  ;;  %v3202_v26 = vld [vmem:[#allocation3 + $0x30] sm:$0xff] }
 0x260   : > { %3190 = vst.msk [vmem:[#allocation3 + $0x50] sm:$0xff] %vm620_vm0, %v3174_v16  ;;  %v2948_v32 = vld [vmem:[#allocation3 + $0x68] sm:$0xff]  ;;  %v3424_v38 = vadd.f32 %v3345_v29, %v3196_v12  ;;  %v4485_v39 = vpop.f32.mrb[66].mxu0 }
 0x261   : > { %v3177_v42 = vadd.f32 %v4482_v10, %v2948_v32  ;;  %v2947_v44 = vld [vmem:[#allocation3 + $0x60] sm:$0xff]  ;;  %3441 = vst.msk [vmem:[#allocation3 + $0x8] sm:$0xff] %vm620_vm0, %v3425_v56  ;;  %v3155_v45 = vpop.f32.mrb[67].mxu0 }
 0x262   : > { %v3176_v48 = vadd.f32 %v3145_v55, %v2947_v44  ;;  %3440 = vst.msk [vmem:[#allocation3] sm:$0xff] %vm620_vm0, %v3424_v38  ;;  %v4493_v51 = vpop.f32.mrb[70].mxu1  ;;  %v3205_v37 = vld [vmem:[#allocation3 + $0x48] sm:$0xff] }
 0x263   : > { %3193 = vst.msk [vmem:[#allocation3 + $0x68] sm:$0xff] %vm620_vm0, %v3177_v42  ;;  %v3427_v52 = vadd.f32 %v4493_v51, %v3199_v49  ;;  %v3355_v58 = vpop.f32.mrb[71].mxu1  ;;  %v3204_v53 = vld [vmem:[#allocation3 + $0x40] sm:$0xff] }
 0x264   : > { %3192 = vst.msk [vmem:[#allocation3 + $0x60] sm:$0xff] %vm620_vm0, %v3176_v48  ;;  %v3426_v60 = vadd.f32 %v3355_v58, %v3198_v57  ;;  %v2950_v61 = vld [vmem:[#allocation3 + $0x78] sm:$0xff] }
 0x265   : > { %3443 = vst.msk [vmem:[#allocation3 + $0x18] sm:$0xff] %vm620_vm0, %v3427_v52  ;;  %v3179_v63 = vadd.f32 %v4485_v39, %v2950_v61  ;;  %v2949_v0 = vld [vmem:[#allocation3 + $0x70] sm:$0xff] }
 0x266   : > { %3442 = vst.msk [vmem:[#allocation3 + $0x10] sm:$0xff] %vm620_vm0, %v3426_v60  ;;  %v3178_v2 = vadd.f32 %v3155_v45, %v2949_v0  ;;  %v4496_v5 = vpop.f32.mrb[72].mxu1  ;;  %v3207_v10 = vld [vmem:[#allocation3 + $0x58] sm:$0xff] }
 0x267   : > { %3195 = vst.msk [vmem:[#allocation3 + $0x78] sm:$0xff] %vm620_vm0, %v3179_v63  ;;  %v3429_v8 = vadd.f32 %v4496_v5, %v3201_v3  ;;  %v3365_v13 = vpop.f32.mrb[73].mxu1  ;;  %v3206_v17 = vld [vmem:[#allocation3 + $0x50] sm:$0xff] }
 0x268   : > { %3194 = vst.msk [vmem:[#allocation3 + $0x70] sm:$0xff] %vm620_vm0, %v3178_v2  ;;  %v3428_v46 = vadd.f32 %v3365_v13, %v3200_v11  ;;  %v3457_v19 = vld [vmem:[#allocation3 + $0x8] sm:$0xff] }
 0x269   : > { %3445 = vst.msk [vmem:[#allocation3 + $0x28] sm:$0xff] %vm620_vm0, %v3429_v8  ;;  %v3456_v20 = vld [vmem:[#allocation3] sm:$0xff]  ;;  %v3480_v21 = vmul.f32 %v5531_v6, %v3457_v19 }
 0x26a   : > { %3444 = vst.msk [vmem:[#allocation3 + $0x20] sm:$0xff] %vm620_vm0, %v3428_v46  ;;  %v4499_v23 = vpop.f32.mrb[74].mxu1  ;;  %v3479_v24 = vmul.f32 %v5531_v6, %v3456_v20  ;;  %v3209_v44 = vld [vmem:[#allocation3 + $0x68] sm:$0xff] }
 0x26b   : > { %v3431_v25 = vadd.f32 %v4499_v23, %v3203_v22  ;;  %v3375_v27 = vpop.f32.mrb[75].mxu1  ;;  %v3503_v28 = vadd.f32 %v5538_v18, %v3480_v21  ;;  %v3208_v52 = vld [vmem:[#allocation3 + $0x60] sm:$0xff] }
 0x26c   : > { %v3430_v30 = vadd.f32 %v3375_v27, %v3202_v26  ;;  %v3502_v31 = vadd.f32 %v5538_v18, %v3479_v24  ;;  %v3459_v33 = vld [vmem:[#allocation3 + $0x18] sm:$0xff] }
 0x26d   : > { %3447 = vst.msk [vmem:[#allocation3 + $0x38] sm:$0xff] %vm620_vm0, %v3431_v25  ;;  %v3458_v34 = vld [vmem:[#allocation3 + $0x10] sm:$0xff]  ;;  %v3482_v36 = vmul.f32 %v5531_v6, %v3459_v33  ;;  %v3519_v62 = vmax.f32 %v3503_v28, 0.0 }
 0x26e   : > { %3446 = vst.msk [vmem:[#allocation3 + $0x30] sm:$0xff] %vm620_vm0, %v3430_v30  ;;  %v4502_v40 = vpop.f32.mrb[76].mxu1  ;;  %v3518_v43 = vmax.f32 %v3502_v31, 0.0  ;;  %v3481_v47 = vmul.f32 %v5531_v6, %v3458_v34  ;;  %v3211_v5 = vld [vmem:[#allocation3 + $0x78] sm:$0xff] }
 0x26f   : > { %v3433_v50 = vadd.f32 %v4502_v40, %v3205_v37  ;;  %v3385_v59 = vpop.f32.mrb[77].mxu1  ;;  %v3505_v1 = vadd.f32 %v5538_v18, %v3482_v36  ;;  %v3210_v19 = vld [vmem:[#allocation3 + $0x70] sm:$0xff] }
 0x270   : > { %v3432_v35 = vadd.f32 %v3385_v59, %v3204_v53  ;;  %4514 = vmatprep.mubr.msk.f32.mxu0 %vm620_vm0, %v3518_v43  ;;  %v3504_v41 = vadd.f32 %v5538_v18, %v3481_v47  ;;  %v3461_v4 = vld [vmem:[#allocation3 + $0x28] sm:$0xff] }
 0x271   : > { %3449 = vst.msk [vmem:[#allocation3 + $0x48] sm:$0xff] %vm620_vm0, %v3433_v50  ;;  %4515 = vmatmul.mubr.msk.f32.vlgmr.msra.gmra.mrb[68].mxu0 %vm620_vm0, %v3519_v62  ;;  %v3460_v7 = vld [vmem:[#allocation3 + $0x20] sm:$0xff]  ;;  %v3484_v9 = vmul.f32 %v5531_v6, %v3461_v4  ;;  %v3521_v56 = vmax.f32 %v3505_v1, 0.0 }
 0x272   : > { %3448 = vst.msk [vmem:[#allocation3 + $0x40] sm:$0xff] %vm620_vm0, %v3432_v35  ;;  %v4505_v14 = vpop.f32.mrb[78].mxu1  ;;  %v3520_v15 = vmax.f32 %v3504_v41, 0.0  ;;  %v3483_v55 = vmul.f32 %v5531_v6, %v3460_v7 }
 0x273   : > { %v3435_v16 = vadd.f32 %v4505_v14, %v3207_v10  ;;  %v3395_v54 = vpop.f32.mrb[79].mxu1  ;;  %v3507_v12 = vadd.f32 %v5538_v18, %v3484_v9 }
 0x274   : > { %v3434_v29 = vadd.f32 %v3395_v54, %v3206_v17  ;;  %4517 = vmatprep.mubr.msk.f32.mxu0 %vm620_vm0, %v3520_v15  ;;  %v3506_v32 = vadd.f32 %v5538_v18, %v3483_v55  ;;  %v3463_v38 = vld [vmem:[#allocation3 + $0x38] sm:$0xff] }
 0x275   : > { %3451 = vst.msk [vmem:[#allocation3 + $0x58] sm:$0xff] %vm620_vm0, %v3435_v16  ;;  %4518 = vmatmul.mubr.msk.f32.gmra.mrb[70].mxu0 %vm620_vm0, %v3521_v56  ;;  %v3462_v39 = vld [vmem:[#allocation3 + $0x30] sm:$0xff]  ;;  %v3486_v42 = vmul.f32 %v5531_v6, %v3463_v38  ;;  %v3523_v58 = vmax.f32 %v3507_v12, 0.0 }
 0x276   : > { %3450 = vst.msk [vmem:[#allocation3 + $0x50] sm:$0xff] %vm620_vm0, %v3434_v29  ;;  %v4508_v45 = vpop.f32.mrb[80].mxu1  ;;  %v3522_v48 = vmax.f32 %v3506_v32, 0.0  ;;  %v3485_v49 = vmul.f32 %v5531_v6, %v3462_v39 }
 0x277   : > { %v3437_v51 = vadd.f32 %v4508_v45, %v3209_v44  ;;  %v3405_v57 = vpop.f32.mrb[81].mxu1  ;;  %v3509_v60 = vadd.f32 %v5538_v18, %v3486_v42 }
 0x278   : > { %v3436_v61 = vadd.f32 %v3405_v57, %v3208_v52  ;;  %4520 = vmatprep.mubr.msk.f32.mxu0 %vm620_vm0, %v3522_v48  ;;  %v3508_v63 = vadd.f32 %v5538_v18, %v3485_v49  ;;  %v3465_v0 = vld [vmem:[#allocation3 + $0x48] sm:$0xff] }
 0x279   : > { %3453 = vst.msk [vmem:[#allocation3 + $0x68] sm:$0xff] %vm620_vm0, %v3437_v51  ;;  %4521 = vmatmul.mubr.msk.f32.gmra.mrb[72].mxu0 %vm620_vm0, %v3523_v58  ;;  %v3464_v2 = vld [vmem:[#allocation3 + $0x40] sm:$0xff]  ;;  %v3488_v3 = vmul.f32 %v5531_v6, %v3465_v0  ;;  %v3525_v21 = vmax.f32 %v3509_v60, 0.0 }
 0x27a   : > { %3452 = vst.msk [vmem:[#allocation3 + $0x60] sm:$0xff] %vm620_vm0, %v3436_v61  ;;  %v4511_v8 = vpop.f32.mrb[82].mxu1  ;;  %v3524_v11 = vmax.f32 %v3508_v63, 0.0  ;;  %v3487_v13 = vmul.f32 %v5531_v6, %v3464_v2 }
 0x27b   : > { %v3439_v46 = vadd.f32 %v4511_v8, %v3211_v5  ;;  %v3415_v20 = vpop.f32.mrb[83].mxu1  ;;  %v3511_v22 = vadd.f32 %v5538_v18, %v3488_v3 }
 0x27c   : > { %v3438_v23 = vadd.f32 %v3415_v20, %v3210_v19  ;;  %4523 = vmatprep.mubr.msk.f32.mxu0 %vm620_vm0, %v3524_v11  ;;  %v3510_v24 = vadd.f32 %v5538_v18, %v3487_v13  ;;  %v3467_v25 = vld [vmem:[#allocation3 + $0x58] sm:$0xff] }
 0x27d   : > { %3455 = vst.msk [vmem:[#allocation3 + $0x78] sm:$0xff] %vm620_vm0, %v3439_v46  ;;  %4524 = vmatmul.mubr.msk.f32.gmra.mrb[74].mxu0 %vm620_vm0, %v3525_v21  ;;  %v3466_v26 = vld [vmem:[#allocation3 + $0x50] sm:$0xff]  ;;  %v3490_v27 = vmul.f32 %v5531_v6, %v3467_v25  ;;  %v3527_v31 = vmax.f32 %v3511_v22, 0.0 }
 0x27e   : > { %3454 = vst.msk [vmem:[#allocation3 + $0x70] sm:$0xff] %vm620_vm0, %v3438_v23  ;;  %v3526_v28 = vmax.f32 %v3510_v24, 0.0  ;;  %v3489_v30 = vmul.f32 %v5531_v6, %v3466_v26 }
 0x27f   : > { %v3513_v33 = vadd.f32 %v5538_v18, %v3490_v27 }
 0x280   : > { %4526 = vmatprep.mubr.msk.f32.mxu0 %vm620_vm0, %v3526_v28  ;;  %v3512_v34 = vadd.f32 %v5538_v18, %v3489_v30  ;;  %v3469_v36 = vld [vmem:[#allocation3 + $0x68] sm:$0xff] }
 0x281   : > { %4527 = vmatmul.mubr.msk.f32.gmra.mrb[76].mxu0 %vm620_vm0, %v3527_v31  ;;  %v3468_v37 = vld [vmem:[#allocation3 + $0x60] sm:$0xff]  ;;  %v3492_v40 = vmul.f32 %v5531_v6, %v3469_v36  ;;  %v3529_v50 = vmax.f32 %v3513_v33, 0.0 }
 0x282   : > { %v3528_v43 = vmax.f32 %v3512_v34, 0.0  ;;  %v3491_v47 = vmul.f32 %v5531_v6, %v3468_v37 }
 0x283   : > { %v3515_v53 = vadd.f32 %v5538_v18, %v3492_v40 }
 0x284   : > { %4529 = vmatprep.mubr.msk.f32.mxu0 %vm620_vm0, %v3528_v43  ;;  %v3514_v59 = vadd.f32 %v5538_v18, %v3491_v47  ;;  %v3471_v62 = vld [vmem:[#allocation3 + $0x78] sm:$0xff] }
 0x285   : > { %4530 = vmatmul.mubr.msk.f32.gmra.mrb[78].mxu0 %vm620_vm0, %v3529_v50  ;;  %v3470_v1 = vld [vmem:[#allocation3 + $0x70] sm:$0xff]  ;;  %v3494_v35 = vmul.f32 %v5531_v6, %v3471_v62  ;;  %v3531_v7 = vmax.f32 %v3515_v53, 0.0 }
 0x286   : > { %v3530_v41 = vmax.f32 %v3514_v59, 0.0  ;;  %v3493_v4 = vmul.f32 %v5531_v6, %v3470_v1 }
 0x287   : > { %v3517_v9 = vadd.f32 %v5538_v18, %v3494_v35 }
 0x288   : > { %4532 = vmatprep.mubr.msk.f32.mxu0 %vm620_vm0, %v3530_v41  ;;  %v3516_v10 = vadd.f32 %v5538_v18, %v3493_v4 }
 0x289   : > { %4533 = vmatmul.mubr.msk.f32.gmra.mrb[80].mxu0 %vm620_vm0, %v3531_v7  ;;  %v3533_v15 = vmax.f32 %v3517_v9, 0.0 }
 0x28a   : > { %v3532_v14 = vmax.f32 %v3516_v10, 0.0 }
 0x28c   : > { %4535 = vmatprep.mubr.msk.f32.mxu0 %vm620_vm0, %v3532_v14 }
 0x28d   : > { %4536 = vmatmul.mubr.msk.f32.gmra.mrb[82].mxu0 %vm620_vm0, %v3533_v15 }
 0x344   : > { %v4516_v55 = vpop.f32.mrb[68].mxu0 }
 0x345   : > { %v3649_v16 = vpop.f32.mrb[69].mxu0 }
 0x346   : > { %3721 = vst.msk [vmem:[%s583_s15] sm:$0xff] %vm3720_vm3, %v3649_v16 }
 0x348   : > { %v4519_v6 = vpop.f32.mrb[70].mxu0 }
 0x349   : > { %v3658_v17 = vpop.f32.mrb[71].mxu0 }
 0x34a   : > { %3722 = vst.msk [vmem:[%s583_s15 + $0x8] sm:$0xff] %vm3720_vm3, %v3658_v17 }
 0x34c   : > { %v4522_v18 = vpop.f32.mrb[72].mxu0 }
 0x34d   : > { %v3667_v54 = vpop.f32.mrb[73].mxu0 }
 0x34e   : > { %3723 = vst.msk [vmem:[%s583_s15 + $0x10] sm:$0xff] %vm3720_vm3, %v3667_v54 }
 0x350   : > { %v4525_v56 = vpop.f32.mrb[74].mxu0 }
 0x351   : > { %v3676_v12 = vpop.f32.mrb[75].mxu0 }
 0x352   : > { %3724 = vst.msk [vmem:[%s583_s15 + $0x18] sm:$0xff] %vm3720_vm3, %v3676_v12 }
 0x354   : > { %v4528_v29 = vpop.f32.mrb[76].mxu0 }
 0x355   : > { %v3685_v32 = vpop.f32.mrb[77].mxu0 }
 0x356   : > { %3725 = vst.msk [vmem:[%s583_s15 + $0x20] sm:$0xff] %vm3720_vm3, %v3685_v32 }
 0x358   : > { %v4531_v38 = vpop.f32.mrb[78].mxu0 }
 0x359   : > { %v3694_v39 = vpop.f32.mrb[79].mxu0 }
 0x35a   : > { %3726 = vst.msk [vmem:[%s583_s15 + $0x28] sm:$0xff] %vm3720_vm3, %v3694_v39 }
 0x35c   : > { %v4534_v42 = vpop.f32.mrb[80].mxu0 }
 0x35d   : > { %v3703_v44 = vpop.f32.mrb[81].mxu0 }
 0x35e   : > { %3727 = vst.msk [vmem:[%s583_s15 + $0x30] sm:$0xff] %vm3720_vm3, %v3703_v44 }
 0x360   : > { %v4537_v45 = vpop.f32.mrb[82].mxu0 }
 0x361   : > { %v3712_v48 = vpop.f32.mrb[83].mxu0 }
 0x362   : > { %3728 = vst.msk [vmem:[%s583_s15 + $0x38] sm:$0xff] %vm3720_vm3, %v3712_v48 }
 0x363   : > { %4611 = shalt.err (!%p4608_p7)
}
 0x364   : > { %s4612_s1 = scalar_lea.hbm %s5612_s25, 1024  ;;  %s4616_s18 = scalar_lea.hbm %s5678_s12, 2048 }
 0x365   : > { %p4613_p8 = scmp.ne.s32.totalorder %s5612_s25, %s4612_s1  ;;  %p4617_p13 = scmp.lt.u32.totalorder %s5612_s25, %s5678_s12 }
 0x366   : > { %p4618_p0 = scmp.lt.u32.totalorder %s4616_s18, %s4612_s1  ;;  %p4620_p2 = scmp.lt.u32.totalorder %s4612_s1, %s5612_s25 }
 0x367   : > { %p4614_p11 = pnand %p4613_p8, %p4786_p5 }
 0x368   : > { %p4619_p1 = por %p4618_p0, %p4617_p13 }
 0x369   : > { %p4615_p12 = pneg %p4614_p11 }
 0x36a   : > { %p4621_p3 = por %p4620_p2, %p4619_p1 }
 0x36c   : > { %p4622_p4 = pnand %p4621_p3, %p4615_p12 }
 0x36e   : > { %4625 = shalt.err (!%p4622_p4)
}
 0x36f   : > { %s4680_s26 = smov 128   ;;  %s4681_s13 = smov 8  }
 0x370   : > { %4540 = dma.vmem_to_hbm [thread:$0]  (%p4786_p5), %s5614_s16, 1024, %s5612_s25, %s5619_s22, %s4680_s26, %s4680_s26, %s4681_s13  }
 0x371 PF: > { %s3760_s15 = sand.u32 1, %s4656_s19   ;;  %p4543_p6 = pnand %p3872_p10, %p4797_p9 }
 0x372   : > { %s3761_s1 = scalar_lea.sflag [#allocation6], %s3760_s15 }
 0x373   : > { %4651 = dma.done.wait (!%p4543_p6), %s3761_s1, 1024  }
 0x374   : > { %4653 = vsyncadd (!%p4543_p6), %s3761_s1, 4294966272  ;;  %s25_s24 = sadd.s32 1, %s4676_s24   ;;  %s5681_s19 = smov %s4660_s20 }
 0x375   : > { %p22_p7 = scmp.ge.s32.totalorder %s25_s24, 4   ;;  %s5682_s20 = smov %s4664_s21 }
 0x376   : > { %s5683_s21 = smov %s4795_s30  ;;  %s5684_s22 = smov %s4672_s23 }
 0x377   : > { %s5685_s23 = smov %s5687_s27  ;;  %24 = sbr.rel (!%p22_p7) target bundleno = 4 (0x4), region = 171 }
 0x37e   :  { %3766 = vsyncpa [#allocation6], 1 }
 0x37f   :  { %3768 = vsyncpa [#allocation6 + $0x1], 1 }

</bundles_post_ra>
